<compile_context>
chip_gen: v5e
topology: v5e:2x2
jax: 0.10.0
libtpu: 0.0.40
codegen_flags: <defaults>
</compile_context>

<pallas_src>
import jax
import jax.numpy as jnp
from jax import lax
from jax.experimental import pallas as pl
from jax.experimental.pallas import tpu as pltpu  # noqa: F401  (kept for parity / future tuning)

BN_EPS = 1e-3


def _se_conv_bn_kernel(gate_ref, x_ref, w_ref, gamma_ref, beta_ref, o_ref):
    # gate_ref  : (1, Cin)    pre-sigmoid SE logits
    # x_ref     : (Cin, P)    activations, P = N*H*W (channels-major, free reshape for N=1)
    # w_ref     : (Cout, Cin) 1x1 conv weight (native OIHW order, squeezed)
    # gamma_ref : (Cout, 1)   BN scale
    # beta_ref  : (Cout, 1)   BN shift
    # o_ref     : (Cout, P)
    gate = jax.nn.sigmoid(gate_ref[...])                  # (1, Cin)   EUP
    w_scaled = w_ref[...] * gate                          # (Cout, Cin) tiny VPU pass
    y = jnp.dot(w_scaled, x_ref[...],
                preferred_element_type=jnp.float32)       # MXU: (Cout, P)

    # BatchNorm2d (training mode): biased batch stats per channel over P.
    p = y.shape[1]
    inv_p = 1.0 / p
    s = jnp.sum(y, axis=1, keepdims=True)                 # (Cout, 1)  XLU lane reduce
    ss = jnp.sum(y * y, axis=1, keepdims=True)            # (Cout, 1)
    mean = s * inv_p
    var = ss * inv_p - mean * mean                        # E[y^2] - E[y]^2 (biased)
    inv_std = lax.rsqrt(var + BN_EPS)
    scale = gamma_ref[...] * inv_std                      # (Cout, 1)
    shift = beta_ref[...] - mean * scale                  # (Cout, 1)
    o_ref[...] = y * scale + shift                        # single fused FMA pass


def se_conv_bn(x_nchw, gate_nc11, w_oihw, gamma, beta):
    """x_nchw: (1, Cin, H, W); gate_nc11: (1, Cin, 1, 1); w_oihw: (Cout, Cin, 1, 1)."""
    n, cin, h, w = x_nchw.shape
    cout = w_oihw.shape[0]
    assert n == 1, "channels-major layout trick assumes batch size 1 (as in the spec)"
    p = n * h * w

    # All of these reshapes are free (no data movement).
    x2d = x_nchw.reshape(cin, p)                # (Cin, P)
    gate2d = gate_nc11.reshape(1, cin)          # (1, Cin)
    w2d = w_oihw.reshape(cout, cin)             # (Cout, Cin)
    gamma2d = gamma.reshape(cout, 1)
    beta2d = beta.reshape(cout, 1)

    out2d = pl.pallas_call(
        _se_conv_bn_kernel,
        out_shape=jax.ShapeDtypeStruct((cout, p), jnp.float32),
        in_specs=[
            pl.BlockSpec((1, cin), lambda: (0, 0)),
            pl.BlockSpec((cin, p), lambda: (0, 0)),
            pl.BlockSpec((cout, cin), lambda: (0, 0)),
            pl.BlockSpec((cout, 1), lambda: (0, 0)),
            pl.BlockSpec((cout, 1), lambda: (0, 0)),
        ],
        out_specs=pl.BlockSpec((cout, p), lambda: (0, 0)),
    )(gate2d, x2d, w2d, gamma2d, beta2d)

    # (Cout, P) -> (1, Cout, H, W): free reshape, no transpose.
    return out2d.reshape(n, cout, h, w)


def _reference(x_nchw, gate_nc11, w_oihw, gamma, beta):
    g = jax.nn.sigmoid(gate_nc11)
    xg = g * x_nchw
    y = lax.conv_general_dilated(xg, w_oihw, window_strides=(1, 1), padding='VALID',
                                 dimension_numbers=('NCHW', 'OIHW', 'NCHW'))
    mean = jnp.mean(y, axis=(0, 2, 3), keepdims=True)
    var = jnp.var(y, axis=(0, 2, 3), keepdims=True)
    yhat = (y - mean) * lax.rsqrt(var + BN_EPS)
    return yhat * gamma.reshape(1, -1, 1, 1) + beta.reshape(1, -1, 1, 1)


if __name__ == "__main__":
    key = jax.random.PRNGKey(0)
    k1, k2, k3, k4, k5 = jax.random.split(key, 5)

    N, CIN, COUT, H, W = 1, 240, 64, 28, 28
    x124 = jax.random.normal(k1, (N, CIN, H, W), dtype=jnp.float32)
    x128 = jax.random.normal(k2, (1, CIN, 1, 1), dtype=jnp.float32)

    # Deterministic parameter init (synthetic, not a checkpoint load)
    conv_w = jax.random.normal(k3, (COUT, CIN, 1, 1), dtype=jnp.float32) * 0.05
    bn_gamma = 1.0 + 0.1 * jax.random.normal(k4, (COUT,), dtype=jnp.float32)
    bn_beta = 0.1 * jax.random.normal(k5, (COUT,), dtype=jnp.float32)

    out = se_conv_bn(x124, x128, conv_w, bn_gamma, bn_beta)
    out = jax.block_until_ready(out)

    ref = _reference(x124, x128, conv_w, bn_gamma, bn_beta)
    assert out.shape == (N, COUT, H, W)
    assert jnp.allclose(out, ref, atol=1e-3, rtol=1e-3), "mismatch vs reference"

    print("KERNEL_OK")
</pallas_src>

<mosaic_0001>
module attributes {stable_mosaic.version = 11 : i64} {
  func.func @_se_conv_bn_kernel(%arg0: memref<1x240xf32, #tpu.memory_space<vmem>>, %arg1: memref<240x784xf32, #tpu.memory_space<vmem>>, %arg2: memref<64x240xf32, #tpu.memory_space<vmem>>, %arg3: memref<64x1xf32, #tpu.memory_space<vmem>>, %arg4: memref<64x1xf32, #tpu.memory_space<vmem>>, %arg5: memref<64x784xf32, #tpu.memory_space<vmem>>) attributes {dimension_semantics = [], scalar_prefetch = 0 : i64, scratch_operands = 0 : i64, tpu.core_type = #tpu.core_type<tc>} {
    %c0 = arith.constant 0 : index
    %c0_0 = arith.constant 0 : index
    %0 = vector.load %arg0[%c0, %c0_0] : memref<1x240xf32, #tpu.memory_space<vmem>>, vector<1x240xf32>
    %1 = arith.negf %0 : vector<1x240xf32>
    %2 = math.exp %1 : vector<1x240xf32>
    %cst = arith.constant 1.000000e+00 : f32
    %3 = vector.broadcast %cst : f32 to vector<1x240xf32>
    %4 = arith.addf %3, %2 : vector<1x240xf32>
    %5 = arith.divf %3, %4 : vector<1x240xf32>
    %c0_1 = arith.constant 0 : index
    %c0_2 = arith.constant 0 : index
    %6 = vector.load %arg2[%c0_1, %c0_2] : memref<64x240xf32, #tpu.memory_space<vmem>>, vector<64x240xf32>
    %7 = vector.broadcast %5 : vector<1x240xf32> to vector<64x240xf32>
    %8 = arith.mulf %6, %7 : vector<64x240xf32>
    %c0_3 = arith.constant 0 : index
    %c0_4 = arith.constant 0 : index
    %9 = vector.load %arg1[%c0_3, %c0_4] : memref<240x784xf32, #tpu.memory_space<vmem>>, vector<240x784xf32>
    %cst_5 = arith.constant dense<0.000000e+00> : vector<64x784xf32>
    %10 = tpu.matmul %8, %9, %cst_5 {dimension_numbers = #tpu.dot_dimension_numbers<[1], [0], [0], [1], [0, 0, 1, 1], [], []>} : vector<64x240xf32>, vector<240x784xf32>, vector<64x784xf32> -> vector<64x784xf32>
    %cst_6 = arith.constant dense<0.000000e+00> : vector<64xf32>
    %11 = vector.multi_reduction <add>, %10, %cst_6 [1] : vector<64x784xf32> to vector<64xf32>
    %12 = vector.shape_cast %11 : vector<64xf32> to vector<64x1xf32>
    %13 = arith.mulf %10, %10 : vector<64x784xf32>
    %cst_7 = arith.constant dense<0.000000e+00> : vector<64xf32>
    %14 = vector.multi_reduction <add>, %13, %cst_7 [1] : vector<64x784xf32> to vector<64xf32>
    %15 = vector.shape_cast %14 : vector<64xf32> to vector<64x1xf32>
    %cst_8 = arith.constant 0.00127551018 : f32
    %16 = vector.broadcast %cst_8 : f32 to vector<64x1xf32>
    %17 = arith.mulf %12, %16 : vector<64x1xf32>
    %cst_9 = arith.constant 0.00127551018 : f32
    %18 = vector.broadcast %cst_9 : f32 to vector<64x1xf32>
    %19 = arith.mulf %15, %18 : vector<64x1xf32>
    %20 = arith.mulf %17, %17 : vector<64x1xf32>
    %21 = arith.subf %19, %20 : vector<64x1xf32>
    %cst_10 = arith.constant 1.000000e-03 : f32
    %22 = vector.broadcast %cst_10 : f32 to vector<64x1xf32>
    %23 = arith.addf %21, %22 : vector<64x1xf32>
    %24 = math.rsqrt %23 : vector<64x1xf32>
    %c0_11 = arith.constant 0 : index
    %c0_12 = arith.constant 0 : index
    %25 = vector.load %arg3[%c0_11, %c0_12] : memref<64x1xf32, #tpu.memory_space<vmem>>, vector<64x1xf32>
    %26 = arith.mulf %25, %24 : vector<64x1xf32>
    %c0_13 = arith.constant 0 : index
    %c0_14 = arith.constant 0 : index
    %27 = vector.load %arg4[%c0_13, %c0_14] : memref<64x1xf32, #tpu.memory_space<vmem>>, vector<64x1xf32>
    %28 = arith.mulf %17, %26 : vector<64x1xf32>
    %29 = arith.subf %27, %28 : vector<64x1xf32>
    %30 = vector.broadcast %26 : vector<64x1xf32> to vector<64x784xf32>
    %31 = arith.mulf %10, %30 : vector<64x784xf32>
    %32 = vector.broadcast %29 : vector<64x1xf32> to vector<64x784xf32>
    %33 = arith.addf %31, %32 : vector<64x784xf32>
    %c0_15 = arith.constant 0 : index
    %c0_16 = arith.constant 0 : index
    %34 = vector.load %arg5[%c0_15, %c0_16] : memref<64x784xf32, #tpu.memory_space<vmem>>, vector<64x784xf32>
    tpu.vector_store %arg5[%c0_15, %c0_16], %33 {strides = array<i32>} : memref<64x784xf32, #tpu.memory_space<vmem>>, vector<64x784xf32>,
    return
  }
}

</mosaic_0001>

<bundles_post_ra>
// kernel: tpu_custom_call.1
= control target key start
LH: loop header
LB: loop body
LE: loop exit
PB: predicated region body
PF: predicated region fallthrough
CT: control target
= control target key end

     0   :  { %s3285_s0 = inlined_call_operand.vmem [shape: f32[1,240], index: 0, kind: input, shape index: {}]   ;;  %s3286_s1 = inlined_call_operand.vmem [shape: f32[240,784], index: 1, kind: input, shape index: {}]   ;;  %s3287_s2 = inlined_call_operand.vmem [shape: f32[64,240], index: 2, kind: input, shape index: {}]   ;;  %s3288_s3 = inlined_call_operand.vmem [shape: f32[64,1], index: 3, kind: input, shape index: {}]   ;;  %s3289_s4 = inlined_call_operand.vmem [shape: f32[64,1], index: 4, kind: input, shape index: {}]   ;;  %s3290_s5 = inlined_call_operand.hbm [shape: f32[64,784], index: 5, kind: output, shape index: {}]  }
   0x1   :  { %v183_v0 = vld [vmem:[%s3286_s1 + $0x348] sm:$0xff]  ;;  %v184_v1 = vld [vmem:[%s3286_s1 + $0x350] sm:$0xff]  ;;  %v177_v3 = vld [vmem:[%s3286_s1 + $0x318] sm:$0xff] }
   0x2   :  { %v176_v2 = vld [vmem:[%s3286_s1 + $0x310] sm:$0xff]  ;;  %313 = vmatpush.msra.mxu0 %v183_v0  ;;  %395 = vmatpush.msra.mxu2 %v184_v1  ;;  %v169_v4 = vld [vmem:[%s3286_s1 + $0x2d8] sm:$0xff]  ;;  %v170_v5 = vld [vmem:[%s3286_s1 + $0x2e0] sm:$0xff] }
   0x3   :  { %v1707_v6 = vld [vmem:[%s3286_s1 + $0x660] sm:$0xff]  ;;  %v1712_v7 = vld [vmem:[%s3286_s1 + $0x628] sm:$0xff]  ;;  %v1724_v10 = vld [vmem:[%s3286_s1 + $0x658] sm:$0xff] }
   0x4   :  { %314 = vmatpush.msra.mxu0 %v176_v2  ;;  %396 = vmatpush.msra.mxu2 %v177_v3  ;;  %v162_v8 = vld [vmem:[%s3286_s1 + $0x2a0] sm:$0xff]  ;;  %v163_v9 = vld [vmem:[%s3286_s1 + $0x2a8] sm:$0xff]  ;;  %v1729_v11 = vld [vmem:[%s3286_s1 + $0x5f0] sm:$0xff] }
   0x5   :  { %1585 = vmatpush.msra.mxu3 %v1707_v6  ;;  %v155_v12 = vld [vmem:[%s3286_s1 + $0x268] sm:$0xff]  ;;  %v156_v13 = vld [vmem:[%s3286_s1 + $0x270] sm:$0xff]  ;;  %1571 = vmatpush.msra.mxu1 %v1724_v10  ;;  %v1742_v14 = vld [vmem:[%s3286_s1 + $0x620] sm:$0xff] }
   0x6   :  { %315 = vmatpush.msra.mxu0 %v169_v4  ;;  %397 = vmatpush.msra.mxu2 %v170_v5  ;;  %v1747_v15 = vld [vmem:[%s3286_s1 + $0x5b8] sm:$0xff]  ;;  %v1752_v16 = vld [vmem:[%s3286_s1 + $0x5e8] sm:$0xff]  ;;  %v148_v17 = vld [vmem:[%s3286_s1 + $0x230] sm:$0xff] }
   0x7   :  { %1586 = vmatpush.msra.mxu3 %v1712_v7  ;;  %v149_v18 = vld [vmem:[%s3286_s1 + $0x238] sm:$0xff]  ;;  %1572 = vmatpush.msra.mxu1 %v1742_v14  ;;  %v1765_v19 = vld [vmem:[%s3286_s1 + $0x580] sm:$0xff]  ;;  %v1770_v20 = vld [vmem:[%s3286_s1 + $0x5b0] sm:$0xff] }
   0x8   :  { %316 = vmatpush.msra.mxu0 %v162_v8  ;;  %398 = vmatpush.msra.mxu2 %v163_v9  ;;  %v141_v21 = vld [vmem:[%s3286_s1 + $0x1f8] sm:$0xff]  ;;  %v142_v22 = vld [vmem:[%s3286_s1 + $0x200] sm:$0xff]  ;;  %v1783_v23 = vld [vmem:[%s3286_s1 + $0x548] sm:$0xff] }
   0x9   :  { %1587 = vmatpush.msra.mxu3 %v1729_v11  ;;  %1573 = vmatpush.msra.mxu1 %v1752_v16  ;;  %v1788_v24 = vld [vmem:[%s3286_s1 + $0x578] sm:$0xff]  ;;  %v134_v25 = vld [vmem:[%s3286_s1 + $0x1c0] sm:$0xff]  ;;  %v135_v26 = vld [vmem:[%s3286_s1 + $0x1c8] sm:$0xff] }
   0xa   :  { %317 = vmatpush.msra.mxu0 %v155_v12  ;;  %399 = vmatpush.msra.mxu2 %v156_v13  ;;  %v1801_v27 = vld [vmem:[%s3286_s1 + $0x510] sm:$0xff]  ;;  %v1806_v28 = vld [vmem:[%s3286_s1 + $0x540] sm:$0xff]  ;;  %v127_v29 = vld [vmem:[%s3286_s1 + $0x188] sm:$0xff] }
   0xb   :  { %1588 = vmatpush.msra.mxu3 %v1747_v15  ;;  %1574 = vmatpush.msra.mxu1 %v1770_v20  ;;  %v128_v30 = vld [vmem:[%s3286_s1 + $0x190] sm:$0xff]  ;;  %v1819_v31 = vld [vmem:[%s3286_s1 + $0x4d8] sm:$0xff]  ;;  %v1824_v32 = vld [vmem:[%s3286_s1 + $0x508] sm:$0xff] }
   0xc   :  { %318 = vmatpush.msra.mxu0 %v148_v17  ;;  %400 = vmatpush.msra.mxu2 %v149_v18  ;;  %v120_v33 = vld [vmem:[%s3286_s1 + $0x150] sm:$0xff]  ;;  %v121_v34 = vld [vmem:[%s3286_s1 + $0x158] sm:$0xff]  ;;  %v1837_v35 = vld [vmem:[%s3286_s1 + $0x4a0] sm:$0xff] }
   0xd   :  { %1589 = vmatpush.msra.mxu3 %v1765_v19  ;;  %1575 = vmatpush.msra.mxu1 %v1788_v24  ;;  %v1842_v36 = vld [vmem:[%s3286_s1 + $0x4d0] sm:$0xff]  ;;  %v113_v37 = vld [vmem:[%s3286_s1 + $0x118] sm:$0xff]  ;;  %v114_v38 = vld [vmem:[%s3286_s1 + $0x120] sm:$0xff] }
   0xe   :  { %319 = vmatpush.msra.mxu0 %v141_v21  ;;  %401 = vmatpush.msra.mxu2 %v142_v22  ;;  %v1855_v39 = vld [vmem:[%s3286_s1 + $0x468] sm:$0xff]  ;;  %v1860_v40 = vld [vmem:[%s3286_s1 + $0x498] sm:$0xff]  ;;  %v21_v41 = vld [vmem:[%s3285_s0] sm:$0x3] }
   0xf   :  { %1590 = vmatpush.msra.mxu3 %v1783_v23  ;;  %1576 = vmatpush.msra.mxu1 %v1806_v28  ;;  %v106_v42 = vld [vmem:[%s3286_s1 + $0xe0] sm:$0xff]  ;;  %v107_v43 = vld [vmem:[%s3286_s1 + $0xe8] sm:$0xff]  ;;  %v1514_v44 = vmul.f32 -1.442695, %v21_v41 }
  0x10   :  { %320 = vmatpush.msra.mxu0 %v134_v25  ;;  %402 = vmatpush.msra.mxu2 %v135_v26 }
  0x11   :  { %1591 = vmatpush.msra.mxu3 %v1801_v27  ;;  %1577 = vmatpush.msra.mxu1 %v1824_v32 }
  0x12   :  { %321 = vmatpush.msra.mxu0 %v127_v29  ;;  %403 = vmatpush.msra.mxu2 %v128_v30 }
  0x13   :  { %1592 = vmatpush.msra.mxu3 %v1819_v31  ;;  %1578 = vmatpush.msra.mxu1 %v1842_v36 }
  0x14   :  { %322 = vmatpush.msra.mxu0 %v120_v33  ;;  %404 = vmatpush.msra.mxu2 %v121_v34 }
  0x15   :  { %1593 = vmatpush.msra.mxu3 %v1837_v35 }
  0x16   :  { %10 = vsyncpa [#allocation3], 0  ;;  %323 = vmatpush.msra.mxu0 %v113_v37  ;;  %405 = vmatpush.msra.mxu2 %v114_v38  ;;  %v1876_v45 = vld [vmem:[%s3286_s1 + $0x430] sm:$0xff]  ;;  %v1881_v46 = vld [vmem:[%s3286_s1 + $0x460] sm:$0xff]  ;;  %1606 = vpow2.f32 %v1514_v44  ;;  %vm288_vm4 = vcmask 916480   ;;  %vm892_vm5 = vcmask 130048  }
  0x17   :  { %1594 = vmatpush.msra.mxu3 %v1855_v39  ;;  %v99_v47 = vld [vmem:[%s3286_s1 + $0xa8] sm:$0xff]  ;;  %v100_v48 = vld [vmem:[%s3286_s1 + $0xb0] sm:$0xff]  ;;  %1579 = vmatpush.msra.mxu1 %v1860_v40  ;;  %v1894_v49 = vld [vmem:[%s3286_s1 + $0x3f8] sm:$0xff]  ;;  %s1502_s6 = sshll.u32 %s3290_s5, 4  ;;  %s1654_s7 = smov 896   ;;  %s1503_s6 = int_to_ptr.hbm [resolvable:$true] %s1502_s6 }
  0x18   :  { %324 = vmatpush.msra.mxu0 %v106_v42  ;;  %406 = vmatpush.msra.mxu2 %v107_v43  ;;  %v1899_v50 = vld [vmem:[%s3286_s1 + $0x428] sm:$0xff]  ;;  %v92_v51 = vld [vmem:[%s3286_s1 + $0x70] sm:$0xff]  ;;  %v93_v52 = vld [vmem:[%s3286_s1 + $0x78] sm:$0xff]  ;;  %s1655_s0 = smov 56  }
  0x19   :  { %1595 = vmatpush.msra.mxu3 %v1876_v45  ;;  %1580 = vmatpush.msra.mxu1 %v1881_v46  ;;  %v1912_v53 = vld [vmem:[%s3286_s1 + $0x3c0] sm:$0xff]  ;;  %v1917_v54 = vld [vmem:[%s3286_s1 + $0x3f0] sm:$0xff]  ;;  %v85_v55 = vld [vmem:[%s3286_s1 + $0x38] sm:$0xff] }
  0x1a   :  { %325 = vmatpush.msra.mxu0 %v99_v47  ;;  %407 = vmatpush.msra.mxu2 %v100_v48  ;;  %v86_v56 = vld [vmem:[%s3286_s1 + $0x40] sm:$0xff]  ;;  %v1930_v57 = vld [vmem:[%s3286_s1 + $0x388] sm:$0xff]  ;;  %v1935_v58 = vld [vmem:[%s3286_s1 + $0x3b8] sm:$0xff] }
  0x1b   :  { %1596 = vmatpush.msra.mxu3 %v1894_v49  ;;  %1581 = vmatpush.msra.mxu1 %v1899_v50  ;;  %v78_v60 = vld [vmem:[%s3286_s1] sm:$0xff]  ;;  %v79_v61 = vld [vmem:[%s3286_s1 + $0x8] sm:$0xff]  ;;  %v276_v1 = vld [vmem:[%s3286_s1 + $0x630] sm:$0xff] }
  0x1c   :  { %326 = vmatpush.msra.mxu0 %v92_v51  ;;  %408 = vmatpush.msra.mxu2 %v93_v52  ;;  %v1607_v59 = vpop.eup %1606  ;;  %v283_v63 = vld [vmem:[%s3286_s1 + $0x668] sm:$0xff]  ;;  %v1953_v0 = vld [vmem:[%s3286_s1 + $0x380] sm:$0xff]  ;;  %v185_v2 = vld [vmem:[%s3286_s1 + $0x358] sm:$0xff] }
  0x1d   :  { %1597 = vmatpush.msra.mxu3 %v1912_v53  ;;  %1582 = vmatpush.msra.mxu1 %v1917_v54  ;;  %v25_v62 = vadd.f32 1.0, %v1607_v59  ;;  %v269_v3 = vld [vmem:[%s3286_s1 + $0x5f8] sm:$0xff]  ;;  %v178_v4 = vld [vmem:[%s3286_s1 + $0x320] sm:$0xff]  ;;  %v248_v12 = vld [vmem:[%s3286_s1 + $0x550] sm:$0xff] }
  0x1e   :  { %327 = vmatpush.msra.mxu0 %v85_v55  ;;  %409 = vmatpush.msra.mxu2 %v86_v56  ;;  %v262_v5 = vld [vmem:[%s3286_s1 + $0x5c0] sm:$0xff]  ;;  %v136_v26 = vld [vmem:[%s3286_s1 + $0x1d0] sm:$0xff]  ;;  %v50_v29 = vld [vmem:[%s3287_s2 + $0x48] sm:$0xff] }
  0x1f   :  { %1598 = vmatpush.msra.mxu3 %v1930_v57  ;;  %1583 = vmatpush.msra.mxu1 %v1935_v58  ;;  %1608 = vrcp.f32 %v25_v62  ;;  %vm31_vm0 = vweird.f32 %v25_v62  ;;  %v150_v18 = vld [vmem:[%s3286_s1 + $0x240] sm:$0xff]  ;;  %v220_v30 = vld [vmem:[%s3286_s1 + $0x470] sm:$0xff]  ;;  %v52_v42 = vld [vmem:[%s3287_s2 + $0x58] sm:$0xff] }
  0x20   :  { %328 = vmatpush.msra.mxu0 %v78_v60  ;;  %410 = vmatpush.msra.mxu2 %v79_v61  ;;  %v234_v21 = vld [vmem:[%s3286_s1 + $0x4e0] sm:$0xff]  ;;  %v43_v38 = vld [vmem:[%s3287_s2 + $0x10] sm:$0xff]  ;;  %v199_v44 = vld [vmem:[%s3286_s1 + $0x3c8] sm:$0xff] }
  0x21   :  { %520 = vmatpush.msrb.mxu3 %v283_v63  ;;  %1584 = vmatpush.msra.mxu1 %v1953_v0  ;;  %v206_v41 = vld [vmem:[%s3286_s1 + $0x400] sm:$0xff]  ;;  %v108_v43 = vld [vmem:[%s3286_s1 + $0xf0] sm:$0xff]  ;;  %v54_v51 = vld [vmem:[%s3287_s2 + $0x68] sm:$0xff] }
  0x22   :  { %438 = vmatpush.msrb.mxu2 %v1707_v6  ;;  %356 = vmatpush.msrb.mxu0 %v1724_v10  ;;  %v171_v6 = vld [vmem:[%s3286_s1 + $0x2e8] sm:$0xff]  ;;  %v164_v10 = vld [vmem:[%s3286_s1 + $0x2b0] sm:$0xff]  ;;  %v278_v52 = vld [vmem:[%s3286_s1 + $0x640] sm:$0xff] }
  0x23   :  { %521 = vmatpush.msrb.mxu3 %v276_v1  ;;  %477 = vmatpush.msrb.mxu1 %v185_v2  ;;  %v271_v56 = vld [vmem:[%s3286_s1 + $0x608] sm:$0xff]  ;;  %v264_v60 = vld [vmem:[%s3286_s1 + $0x5d0] sm:$0xff]  ;;  %v257_v61 = vld [vmem:[%s3286_s1 + $0x598] sm:$0xff] }
  0x24   :  { %439 = vmatpush.msrb.mxu2 %v1712_v7  ;;  %357 = vmatpush.msrb.mxu0 %v1742_v14  ;;  %v255_v7 = vld [vmem:[%s3286_s1 + $0x588] sm:$0xff]  ;;  %v35_v14 = vand.u32 2147483647, %v25_v62  ;;  %v180_v63 = vld [vmem:[%s3286_s1 + $0x330] sm:$0xff]  ;;  %v173_v1 = vld [vmem:[%s3286_s1 + $0x2f8] sm:$0xff] }
  0x25   :  { %522 = vmatpush.msrb.mxu3 %v269_v3  ;;  %v1609_v8 = vpop.eup %1608  ;;  %478 = vmatpush.msrb.mxu1 %v178_v4  ;;  %v166_v3 = vld [vmem:[%s3286_s1 + $0x2c0] sm:$0xff] }
  0x26   :  { %440 = vmatpush.msrb.mxu2 %v1729_v11  ;;  %358 = vmatpush.msrb.mxu0 %v1752_v16  ;;  %v27_v9 = vmul.f32 %v1609_v8, %v25_v62  ;;  %v37_v11 = vand.u32 2147483648, %v25_v62  ;;  %vm32_vm1 = vweird.f32 %v1609_v8  ;;  %v157_v16 = vld [vmem:[%s3286_s1 + $0x278] sm:$0xff]  ;;  %vm36_vm3 = vcmp.eq.f32.partialorder %v35_v14, 8.507059e+37  ;;  %v49_v4 = vld [vmem:[%s3287_s2 + $0x40] sm:$0xff]  ;;  %v284_v14 = vld [vmem:[%s3286_s1 + $0x670] sm:$0xff] }
  0x27   :  { %523 = vmatpush.msrb.mxu3 %v262_v5  ;;  %479 = vmatpush.msrb.mxu1 %v171_v6  ;;  %vm2003_vm2 = vmor %vm31_vm0, %vm32_vm1  ;;  %v56_v62 = vld [vmem:[%s3287_s2 + $0x78] sm:$0xff]  ;;  %v159_v5 = vld [vmem:[%s3286_s1 + $0x288] sm:$0xff] }
  0x28   :  { %441 = vmatpush.msrb.mxu2 %v1747_v15  ;;  %359 = vmatpush.msrb.mxu0 %v1770_v20  ;;  %v28_v13 = vsub.f32 1.0, %v27_v9  ;;  %v241_v15 = vld [vmem:[%s3286_s1 + $0x518] sm:$0xff]  ;;  %v250_v6 = vld [vmem:[%s3286_s1 + $0x560] sm:$0xff]  ;;  %v152_v9 = vld [vmem:[%s3286_s1 + $0x250] sm:$0xff] }
  0x29   :  { %524 = vmatpush.msrb.mxu3 %v255_v7  ;;  %480 = vmatpush.msrb.mxu1 %v164_v10  ;;  %v42_v7 = vld [vmem:[%s3287_s2 + $0x8] sm:$0xff]  ;;  %v186_v20 = vld [vmem:[%s3286_s1 + $0x360] sm:$0xff] }
  0x2a   :  { %442 = vmatpush.msrb.mxu2 %v1765_v19  ;;  %360 = vmatpush.msrb.mxu0 %v1788_v24  ;;  %v29_v17 = vmul.f32 %v1609_v8, %v28_v13  ;;  %v38_v19 = vor.u32 1.1754944e-38, %v37_v11  ;;  %v143_v24 = vld [vmem:[%s3286_s1 + $0x208] sm:$0xff]  ;;  %v51_v13 = vld [vmem:[%s3287_s2 + $0x50] sm:$0xff] }
  0x2b   :  { %525 = vmatpush.msrb.mxu3 %v248_v12  ;;  %481 = vmatpush.msrb.mxu1 %v157_v16  ;;  %v145_v12 = vld [vmem:[%s3286_s1 + $0x218] sm:$0xff]  ;;  %v236_v16 = vld [vmem:[%s3286_s1 + $0x4f0] sm:$0xff] }
  0x2c   :  { %443 = vmatpush.msrb.mxu2 %v1783_v23  ;;  %361 = vmatpush.msrb.mxu0 %v1806_v28  ;;  %v30_v22 = vadd.f32 %v1609_v8, %v29_v17  ;;  %v227_v23 = vld [vmem:[%s3286_s1 + $0x4a8] sm:$0xff]  ;;  %v44_v17 = vld [vmem:[%s3287_s2 + $0x18] sm:$0xff] }
  0x2d   :  { %526 = vmatpush.msrb.mxu3 %v241_v15  ;;  %482 = vmatpush.msrb.mxu1 %v150_v18  ;;  %v277_v15 = vld [vmem:[%s3286_s1 + $0x638] sm:$0xff]  ;;  %v138_v18 = vld [vmem:[%s3286_s1 + $0x1e0] sm:$0xff] }
  0x2e   :  { %444 = vmatpush.msrb.mxu2 %v1801_v27  ;;  %362 = vmatpush.msrb.mxu0 %v1824_v32  ;;  %v34_v25 = vsel %vm2003_vm2, %v1609_v8, %v30_v22  ;;  %v41_v27 = vld [vmem:[%s3287_s2] sm:$0xff]  ;;  %v243_v8 = vld [vmem:[%s3286_s1 + $0x528] sm:$0xff] }
  0x2f   :  { %527 = vmatpush.msrb.mxu3 %v234_v21  ;;  %v39_v28 = vsel %vm36_vm3, %v38_v19, %v34_v25  ;;  %483 = vmatpush.msrb.mxu1 %v143_v24  ;;  %v270_v19 = vld [vmem:[%s3286_s1 + $0x600] sm:$0xff]  ;;  %v229_v21 = vld [vmem:[%s3286_s1 + $0x4b8] sm:$0xff]  ;;  %v131_v22 = vld [vmem:[%s3286_s1 + $0x1a8] sm:$0xff] }
  0x30   :  { %445 = vmatpush.msrb.mxu2 %v1819_v31  ;;  %363 = vmatpush.msrb.mxu0 %v1842_v36  ;;  %v2035_v32 = vperm.slane %v39_v28, 0  ;;  %v2037_v33 = vperm.slane %v39_v28, 1  ;;  %v129_v31 = vld [vmem:[%s3286_s1 + $0x198] sm:$0xff]  ;;  %v263_v25 = vld [vmem:[%s3286_s1 + $0x5c8] sm:$0xff] }
  0x31   :  { %528 = vmatpush.msrb.mxu3 %v227_v23  ;;  %484 = vmatpush.msrb.mxu1 %v136_v26  ;;  %v213_v36 = vld [vmem:[%s3286_s1 + $0x438] sm:$0xff]  ;;  %v53_v26 = vld [vmem:[%s3287_s2 + $0x60] sm:$0xff]  ;;  %v179_v28 = vld [vmem:[%s3286_s1 + $0x328] sm:$0xff] }
  0x32   :  { %446 = vmatpush.msrb.mxu2 %v1837_v35  ;;  %364 = vmatpush.msrb.mxu0 %v1860_v40  ;;  %v2045_v34 = vmul.f32 %v2035_v32, %v41_v27  ;;  %v2048_v37 = vmul.f32 %v2037_v33, %v50_v29  ;;  %v122_v35 = vld [vmem:[%s3286_s1 + $0x160] sm:$0xff]  ;;  %v115_v40 = vld [vmem:[%s3286_s1 + $0x128] sm:$0xff]  ;;  %v2083_v47 = vmul.f32 %v2035_v32, %v43_v38  ;;  %v172_v27 = vld [vmem:[%s3286_s1 + $0x2f0] sm:$0xff] }
  0x33   :  { %529 = vmatpush.msrb.mxu3 %v220_v30  ;;  %485 = vmatpush.msrb.mxu1 %v129_v31  ;;  %v2086_v48 = vmul.f32 %v2037_v33, %v52_v42  ;;  %v2131_v59 = vmul.f32 %v2037_v33, %v54_v51  ;;  %v2169_v2 = vmul.f32 %v2037_v33, %v56_v62  ;;  %v256_v29 = vld [vmem:[%s3286_s1 + $0x590] sm:$0xff]  ;;  %v46_v30 = vld [vmem:[%s3287_s2 + $0x28] sm:$0xff]  ;;  %v249_v38 = vld [vmem:[%s3286_s1 + $0x558] sm:$0xff] }
  0x34   :  { %329 = vmatmul.f32.vlgmr.msra.gmra.mxu0 %v2045_v34  ;;  %411 = vmatmul.f32.vlgmr.msra.gmra.mxu2 %v2045_v34  ;;  %v2199_v10 = vmul.f32 %v2035_v32, %v49_v4  ;;  %v2202_v11 = vmul.f32 %v2037_v33, %v42_v7  ;;  %v2243_v24 = vmul.f32 %v2035_v32, %v51_v13  ;;  %v124_v31 = vld [vmem:[%s3286_s1 + $0x170] sm:$0xff]  ;;  %v215_v42 = vld [vmem:[%s3286_s1 + $0x448] sm:$0xff]  ;;  %v110_v51 = vld [vmem:[%s3286_s1 + $0x100] sm:$0xff] }
  0x35   :  { %1527 = vmatmul.msk.f32.vlgmr.msra.gmra.mxu3 %vm288_vm4, %v2048_v37  ;;  %1519 = vmatmul.msk.f32.vlgmr.msra.gmra.mxu1 %vm288_vm4, %v2048_v37  ;;  %v2246_v23 = vmul.f32 %v2037_v33, %v44_v17  ;;  %v201_v62 = vld [vmem:[%s3286_s1 + $0x3d8] sm:$0xff]  ;;  %v194_v4 = vld [vmem:[%s3286_s1 + $0x3a0] sm:$0xff] }
  0x36   :  { %530 = vmatpush.msrb.mxu3 %v213_v36  ;;  %486 = vmatpush.msrb.mxu1 %v122_v35  ;;  %v222_v36 = vld [vmem:[%s3286_s1 + $0x480] sm:$0xff]  ;;  %v165_v35 = vld [vmem:[%s3286_s1 + $0x2b8] sm:$0xff] }
  0x37   :  { %447 = vmatpush.msrb.mxu2 %v1855_v39  ;;  %365 = vmatpush.msrb.mxu0 %v1881_v46  ;;  %v101_v39 = vld [vmem:[%s3286_s1 + $0xb8] sm:$0xff]  ;;  %v192_v46 = vld [vmem:[%s3286_s1 + $0x390] sm:$0xff]  ;;  %v82_v13 = vld [vmem:[%s3286_s1 + $0x20] sm:$0xff] }
  0x38   :  { %487 = vmatpush.msrb.mxu1 %v115_v40  ;;  %531 = vmatpush.msrb.mxu3 %v206_v41  ;;  %v2284_v40 = vmul.f32 %v2035_v32, %v53_v26  ;;  %v117_v41 = vld [vmem:[%s3286_s1 + $0x138] sm:$0xff] }
  0x39   :  { %448 = vmatpush.msrb.mxu2 %v1876_v45  ;;  %366 = vmatpush.msrb.mxu0 %v1899_v50  ;;  %v285_v45 = vld [vmem:[%s3286_s1 + $0x678] sm:$0xff]  ;;  %v94_v50 = vld [vmem:[%s3286_s1 + $0x80] sm:$0xff] }
  0x3a   :  { %488 = vmatpush.msrb.mxu1 %v108_v43  ;;  %532 = vmatpush.msrb.mxu3 %v199_v44  ;;  %v2293_v43 = vmul.f32 %v2037_v33, %v46_v30  ;;  %v158_v44 = vld [vmem:[%s3286_s1 + $0x280] sm:$0xff]  ;;  %v109_v7 = vld [vmem:[%s3286_s1 + $0xf8] sm:$0xff]  ;;  %v188_v30 = vld [vmem:[%s3286_s1 + $0x370] sm:$0xff] }
  0x3b   :  { %449 = vmatpush.msrb.mxu2 %v1894_v49  ;;  %367 = vmatpush.msrb.mxu0 %v1917_v54  ;;  %v45_v49 = vld [vmem:[%s3287_s2 + $0x20] sm:$0xff]  ;;  %v87_v54 = vld [vmem:[%s3286_s1 + $0x48] sm:$0xff]  ;;  %v189_v17 = vld [vmem:[%s3286_s1 + $0x378] sm:$0xff] }
  0x3c   :  { %332 = vmatmul.f32.gmra.mxu0 %v2083_v47  ;;  %414 = vmatmul.f32.gmra.mxu2 %v2083_v47  ;;  %v2124_v55 = vmul.f32 %v2035_v32, %v45_v49  ;;  %v235_v49 = vld [vmem:[%s3286_s1 + $0x4e8] sm:$0xff]  ;;  %v265_v26 = vld [vmem:[%s3286_s1 + $0x5d8] sm:$0xff] }
  0x3d   :  { %1528 = vmatmul.msk.f32.gmra.mxu3 %vm288_vm4, %v2086_v48  ;;  %1520 = vmatmul.msk.f32.gmra.mxu1 %vm288_vm4, %v2086_v48 }
  0x3e   :  { %489 = vmatpush.msrb.mxu1 %v101_v39  ;;  %533 = vmatpush.msrb.mxu3 %v192_v46  ;;  %v242_v39 = vld [vmem:[%s3286_s1 + $0x520] sm:$0xff]  ;;  %v55_v46 = vld [vmem:[%s3287_s2 + $0x70] sm:$0xff] }
  0x3f   :  { %450 = vmatpush.msrb.mxu2 %v1912_v53  ;;  %368 = vmatpush.msrb.mxu0 %v1935_v58  ;;  %v80_v53 = vld [vmem:[%s3286_s1 + $0x10] sm:$0xff] }
  0x40   :  { %684 = vmatpush.msra.mxu3 %v285_v45  ;;  %490 = vmatpush.msrb.mxu1 %v94_v50  ;;  %v47_v58 = vld [vmem:[%s3287_s2 + $0x30] sm:$0xff]  ;;  %v151_v45 = vld [vmem:[%s3286_s1 + $0x248] sm:$0xff]  ;;  %v48_v50 = vld [vmem:[%s3287_s2 + $0x38] sm:$0xff] }
  0x41   :  { %451 = vmatpush.msrb.mxu2 %v1930_v57  ;;  %369 = vmatpush.msrb.mxu0 %v1953_v0  ;;  %v187_v57 = vld [vmem:[%s3286_s1 + $0x368] sm:$0xff]  ;;  %v2163_v0 = vmul.f32 %v2035_v32, %v47_v58  ;;  %v137_v58 = vld [vmem:[%s3286_s1 + $0x1d8] sm:$0xff] }
  0x42   :  { %685 = vmatpush.msra.mxu3 %v278_v52  ;;  %491 = vmatpush.msrb.mxu1 %v87_v54  ;;  %v144_v52 = vld [vmem:[%s3286_s1 + $0x210] sm:$0xff] }
  0x43   :  { %602 = vmatpush.msra.mxu2 %v284_v14  ;;  %559 = vmatpush.msra.mxu0 %v186_v20  ;;  %v228_v54 = vld [vmem:[%s3286_s1 + $0x4b0] sm:$0xff]  ;;  %v286_v14 = vld [vmem:[%s3286_s1 + $0x680] sm:$0xff]  ;;  %v95_v20 = vld [vmem:[%s3286_s1 + $0x88] sm:$0xff] }
  0x44   :  { %686 = vmatpush.msra.mxu3 %v271_v56  ;;  %335 = vmatmul.f32.gmra.mxu0 %v2124_v55  ;;  %v208_v56 = vld [vmem:[%s3286_s1 + $0x410] sm:$0xff] }
  0x45   :  { %417 = vmatmul.f32.gmra.mxu2 %v2124_v55  ;;  %1529 = vmatmul.msk.f32.gmra.mxu3 %vm288_vm4, %v2131_v59 }
  0x46   :  { %1521 = vmatmul.msk.f32.gmra.mxu1 %vm288_vm4, %v2131_v59  ;;  %687 = vmatpush.msra.mxu3 %v264_v60  ;;  %v103_v60 = vld [vmem:[%s3286_s1 + $0xc8] sm:$0xff] }
  0x47   :  { %492 = vmatpush.msrb.mxu1 %v80_v53  ;;  %603 = vmatpush.msra.mxu2 %v277_v15  ;;  %v2331_v53 = vmul.f32 %v2035_v32, %v55_v46  ;;  %v221_v32 = vld [vmem:[%s3286_s1 + $0x478] sm:$0xff]  ;;  %v280_v15 = vld [vmem:[%s3286_s1 + $0x650] sm:$0xff] }
  0x48   :  { %688 = vmatpush.msra.mxu3 %v257_v61  ;;  %560 = vmatpush.msra.mxu0 %v179_v28  ;;  %v214_v61 = vld [vmem:[%s3286_s1 + $0x440] sm:$0xff]  ;;  %v81_v28 = vld [vmem:[%s3286_s1 + $0x18] sm:$0xff]  ;;  %v160_v46 = vld [vmem:[%s3286_s1 + $0x290] sm:$0xff] }
  0x49   :  { %641 = vmatpush.msra.mxu1 %v187_v57  ;;  %604 = vmatpush.msra.mxu2 %v270_v19  ;;  %v2337_v57 = vmul.f32 %v2037_v33, %v48_v50  ;;  %v130_v33 = vld [vmem:[%s3286_s1 + $0x1a0] sm:$0xff]  ;;  %v88_v19 = vld [vmem:[%s3286_s1 + $0x50] sm:$0xff] }
  0x4a   :  { %689 = vmatpush.msra.mxu3 %v250_v6  ;;  %561 = vmatpush.msra.mxu0 %v172_v27  ;;  %v116_v6 = vld [vmem:[%s3286_s1 + $0x130] sm:$0xff]  ;;  %v175_v27 = vld [vmem:[%s3286_s1 + $0x308] sm:$0xff]  ;;  %v154_v50 = vld [vmem:[%s3286_s1 + $0x260] sm:$0xff] }
  0x4b   :  { %642 = vmatpush.msra.mxu1 %v180_v63  ;;  %605 = vmatpush.msra.mxu2 %v263_v25  ;;  %v96_v63 = vld [vmem:[%s3286_s1 + $0x90] sm:$0xff]  ;;  %v273_v25 = vld [vmem:[%s3286_s1 + $0x618] sm:$0xff] }
  0x4c   :  { %338 = vmatmul.f32.gmra.mxu0 %v2163_v0  ;;  %690 = vmatpush.msra.mxu3 %v243_v8  ;;  %v200_v8 = vld [vmem:[%s3286_s1 + $0x3d0] sm:$0xff] }
  0x4d   :  { %643 = vmatpush.msra.mxu1 %v173_v1  ;;  %420 = vmatmul.f32.gmra.mxu2 %v2163_v0  ;;  %v123_v1 = vld [vmem:[%s3286_s1 + $0x168] sm:$0xff] }
  0x4e   :  { %1530 = vmatmul.msk.f32.gmra.mxu3 %vm288_vm4, %v2169_v2  ;;  %1522 = vmatmul.msk.f32.gmra.mxu1 %vm288_vm4, %v2169_v2 }
  0x4f   :  { %644 = vmatpush.msra.mxu1 %v166_v3  ;;  %691 = vmatpush.msra.mxu3 %v236_v16  ;;  %v207_v3 = vld [vmem:[%s3286_s1 + $0x408] sm:$0xff]  ;;  %v102_v16 = vld [vmem:[%s3286_s1 + $0xc0] sm:$0xff] }
  0x50   :  { %606 = vmatpush.msra.mxu2 %v256_v29  ;;  %562 = vmatpush.msra.mxu0 %v165_v35  ;;  %v266_v29 = vld [vmem:[%s3286_s1 + $0x5e0] sm:$0xff] }
  0x51   :  { %645 = vmatpush.msra.mxu1 %v159_v5  ;;  %692 = vmatpush.msra.mxu3 %v229_v21  ;;  %v89_v5 = vld [vmem:[%s3286_s1 + $0x58] sm:$0xff]  ;;  %v272_v21 = vld [vmem:[%s3286_s1 + $0x610] sm:$0xff]  ;;  %v258_v35 = vld [vmem:[%s3286_s1 + $0x5a0] sm:$0xff] }
  0x52   :  { %607 = vmatpush.msra.mxu2 %v249_v38  ;;  %563 = vmatpush.msra.mxu0 %v158_v44  ;;  %v168_v38 = vld [vmem:[%s3286_s1 + $0x2d0] sm:$0xff]  ;;  %v167_v44 = vld [vmem:[%s3286_s1 + $0x2c8] sm:$0xff] }
  0x53   :  { %646 = vmatpush.msra.mxu1 %v152_v9  ;;  %693 = vmatpush.msra.mxu3 %v222_v36  ;;  %v193_v9 = vld [vmem:[%s3286_s1 + $0x398] sm:$0xff]  ;;  %v174_v36 = vld [vmem:[%s3286_s1 + $0x300] sm:$0xff] }
  0x54   :  { %341 = vmatmul.f32.gmra.mxu0 %v2199_v10  ;;  %608 = vmatpush.msra.mxu2 %v242_v39  ;;  %v161_v39 = vld [vmem:[%s3286_s1 + $0x298] sm:$0xff] }
  0x55   :  { %423 = vmatmul.f32.gmra.mxu2 %v2199_v10  ;;  %647 = vmatpush.msra.mxu1 %v145_v12  ;;  %v287_v12 = vld [vmem:[%s3286_s1 + $0x688] sm:$0xff] }
  0x56   :  { %1531 = vmatmul.msk.f32.vlgmr.msrb.gmra.mxu3 %vm288_vm4, %v2202_v11  ;;  %493 = vmatmul.f32.vlgmr.msrb.gmra.mxu1 %v2045_v34 }
  0x57   :  { %648 = vmatpush.msra.mxu1 %v138_v18  ;;  %694 = vmatpush.msra.mxu3 %v215_v42  ;;  %v279_v18 = vld [vmem:[%s3286_s1 + $0x648] sm:$0xff] }
  0x58   :  { %564 = vmatpush.msra.mxu0 %v151_v45  ;;  %609 = vmatpush.msra.mxu2 %v235_v49  ;;  %v251_v42 = vld [vmem:[%s3286_s1 + $0x568] sm:$0xff]  ;;  %v252_v45 = vld [vmem:[%s3286_s1 + $0x570] sm:$0xff]  ;;  %v153_v49 = vld [vmem:[%s3286_s1 + $0x258] sm:$0xff] }
  0x59   :  { %649 = vmatpush.msra.mxu1 %v131_v22  ;;  %695 = vmatpush.msra.mxu3 %v208_v56  ;;  %v182_v22 = vld [vmem:[%s3286_s1 + $0x340] sm:$0xff]  ;;  %v147_v56 = vld [vmem:[%s3286_s1 + $0x228] sm:$0xff] }
  0x5a   :  { %565 = vmatpush.msra.mxu0 %v144_v52  ;;  %610 = vmatpush.msra.mxu2 %v228_v54  ;;  %v245_v52 = vld [vmem:[%s3286_s1 + $0x538] sm:$0xff]  ;;  %v146_v54 = vld [vmem:[%s3286_s1 + $0x220] sm:$0xff] }
  0x5b   :  { %650 = vmatpush.msra.mxu1 %v124_v31  ;;  %696 = vmatpush.msra.mxu3 %v201_v62  ;;  %v181_v31 = vld [vmem:[%s3286_s1 + $0x338] sm:$0xff]  ;;  %v132_v62 = vld [vmem:[%s3286_s1 + $0x1b0] sm:$0xff] }
  0x5c   :  { %344 = vmatmul.f32.gmra.mxu0 %v2243_v24  ;;  %611 = vmatpush.msra.mxu2 %v221_v32  ;;  %v139_v32 = vld [vmem:[%s3286_s1 + $0x1e8] sm:$0xff] }
  0x5d   :  { %426 = vmatmul.f32.gmra.mxu2 %v2243_v24  ;;  %651 = vmatpush.msra.mxu1 %v117_v41  ;;  %v259_v41 = vld [vmem:[%s3286_s1 + $0x5a8] sm:$0xff] }
  0x5e   :  { %1532 = vmatmul.msk.f32.gmra.mxu3 %vm288_vm4, %v2246_v23  ;;  %496 = vmatmul.f32.gmra.mxu1 %v2083_v47 }
  0x5f   :  { %652 = vmatpush.msra.mxu1 %v110_v51  ;;  %566 = vmatpush.msra.mxu0 %v137_v58  ;;  %v244_v51 = vld [vmem:[%s3286_s1 + $0x530] sm:$0xff]  ;;  %v238_v58 = vld [vmem:[%s3286_s1 + $0x500] sm:$0xff] }
  0x60   :  { %612 = vmatpush.msra.mxu2 %v214_v61  ;;  %697 = vmatpush.msra.mxu3 %v194_v4  ;;  %v230_v61 = vld [vmem:[%s3286_s1 + $0x4c0] sm:$0xff]  ;;  %v223_v4 = vld [vmem:[%s3286_s1 + $0x488] sm:$0xff] }
  0x61   :  { %653 = vmatpush.msra.mxu1 %v103_v60  ;;  %567 = vmatpush.msra.mxu0 %v130_v33  ;;  %v237_v60 = vld [vmem:[%s3286_s1 + $0x4f8] sm:$0xff]  ;;  %v140_v33 = vld [vmem:[%s3286_s1 + $0x1f0] sm:$0xff] }
  0x62   :  { %613 = vmatpush.msra.mxu2 %v207_v3  ;;  %848 = vmatpush.msrb.mxu3 %v287_v12  ;;  %v125_v3 = vld [vmem:[%s3286_s1 + $0x178] sm:$0xff] }
  0x63   :  { %654 = vmatpush.msra.mxu1 %v96_v63  ;;  %568 = vmatpush.msra.mxu0 %v123_v1  ;;  %v231_v63 = vld [vmem:[%s3286_s1 + $0x4c8] sm:$0xff]  ;;  %v133_v1 = vld [vmem:[%s3286_s1 + $0x1b8] sm:$0xff] }
  0x64   :  { %347 = vmatmul.f32.gmra.mxu0 %v2284_v40  ;;  %614 = vmatpush.msra.mxu2 %v200_v8  ;;  %v118_v8 = vld [vmem:[%s3286_s1 + $0x140] sm:$0xff]  ;;  %v217_v12 = vld [vmem:[%s3286_s1 + $0x458] sm:$0xff] }
  0x65   :  { %429 = vmatmul.f32.gmra.mxu2 %v2284_v40  ;;  %655 = vmatpush.msra.mxu1 %v89_v5  ;;  %v126_v5 = vld [vmem:[%s3286_s1 + $0x180] sm:$0xff] }
  0x66   :  { %1533 = vmatmul.msk.f32.gmra.mxu3 %vm288_vm4, %v2293_v43  ;;  %499 = vmatmul.f32.gmra.mxu1 %v2124_v55 }
  0x67   :  { %569 = vmatpush.msra.mxu0 %v116_v6  ;;  %656 = vmatpush.msra.mxu1 %v82_v13  ;;  %v224_v6 = vld [vmem:[%s3286_s1 + $0x490] sm:$0xff]  ;;  %v111_v13 = vld [vmem:[%s3286_s1 + $0x108] sm:$0xff] }
  0x68   :  { %615 = vmatpush.msra.mxu2 %v193_v9  ;;  %849 = vmatpush.msrb.mxu3 %v280_v15  ;;  %v119_v9 = vld [vmem:[%s3286_s1 + $0x148] sm:$0xff]  ;;  %v210_v15 = vld [vmem:[%s3286_s1 + $0x420] sm:$0xff] }
  0x69   :  { %570 = vmatpush.msra.mxu0 %v109_v7  ;;  %805 = vmatpush.msrb.mxu1 %v189_v17  ;;  %v216_v7 = vld [vmem:[%s3286_s1 + $0x450] sm:$0xff] }
  0x6a   :  { %850 = vmatpush.msrb.mxu3 %v273_v25  ;;  %v104_v17 = vld [vmem:[%s3286_s1 + $0xd0] sm:$0xff]  ;;  %v195_v25 = vld [vmem:[%s3286_s1 + $0x3a8] sm:$0xff] }
  0x6b   :  { %571 = vmatpush.msra.mxu0 %v102_v16  ;;  %806 = vmatpush.msrb.mxu1 %v182_v22  ;;  %v112_v16 = vld [vmem:[%s3286_s1 + $0x110] sm:$0xff]  ;;  %v98_v22 = vld [vmem:[%s3286_s1 + $0xa0] sm:$0xff] }
  0x6c   :  { %350 = vmatmul.f32.gmra.mxu0 %v2331_v53  ;;  %851 = vmatpush.msrb.mxu3 %v266_v29  ;;  %v90_v29 = vld [vmem:[%s3286_s1 + $0x60] sm:$0xff] }
  0x6d   :  { %432 = vmatmul.f32.gmra.mxu2 %v2331_v53  ;;  %572 = vmatpush.msra.mxu0 %v95_v20  ;;  %v105_v20 = vld [vmem:[%s3286_s1 + $0xd8] sm:$0xff] }
  0x6e   :  { %1534 = vmatmul.msk.f32.gmra.mxu3 %vm288_vm4, %v2337_v57  ;;  %502 = vmatmul.f32.gmra.mxu1 %v2163_v0 }
  0x6f   :  { %573 = vmatpush.msra.mxu0 %v88_v19  ;;  %807 = vmatpush.msrb.mxu1 %v175_v27  ;;  %v203_v19 = vld [vmem:[%s3286_s1 + $0x3e8] sm:$0xff]  ;;  %v196_v27 = vld [vmem:[%s3286_s1 + $0x3b0] sm:$0xff] }
  0x70   :  { %852 = vmatpush.msrb.mxu3 %v259_v41 }
  0x71   :  { %574 = vmatpush.msra.mxu0 %v81_v28  ;;  %808 = vmatpush.msrb.mxu1 %v168_v38 }
  0x72   :  { %853 = vmatpush.msrb.mxu3 %v252_v45 }
  0x73   :  { %809 = vmatpush.msrb.mxu1 %v161_v39 }
  0x74   :  { %1515 = vmatmul.msk.f32.vlgmr.msrb.gmra.mxu0 %vm288_vm4, %v2202_v11  ;;  %854 = vmatpush.msrb.mxu3 %v245_v52 }
  0x75   :  { %1523 = vmatmul.msk.f32.vlgmr.msrb.gmra.mxu2 %vm288_vm4, %v2202_v11  ;;  %723 = vmatpush.msrb.mxu0 %v188_v30  ;;  %v91_v30 = vld [vmem:[%s3286_s1 + $0x68] sm:$0xff] }
  0x76   :  { %1535 = vmatmul.msk.f32.gmra.mxu3 %vm288_vm4, %v2048_v37  ;;  %505 = vmatmul.f32.gmra.mxu1 %v2199_v10 }
  0x77   :  { %766 = vmatpush.msrb.mxu2 %v286_v14  ;;  %724 = vmatpush.msrb.mxu0 %v181_v31  ;;  %v209_v14 = vld [vmem:[%s3286_s1 + $0x418] sm:$0xff]  ;;  %v83_v31 = vld [vmem:[%s3286_s1 + $0x28] sm:$0xff] }
  0x78   :  { %810 = vmatpush.msrb.mxu1 %v154_v50  ;;  %855 = vmatpush.msrb.mxu3 %v238_v58 }
  0x79   :  { %767 = vmatpush.msrb.mxu2 %v279_v18  ;;  %725 = vmatpush.msrb.mxu0 %v174_v36  ;;  %v202_v18 = vld [vmem:[%s3286_s1 + $0x3e0] sm:$0xff] }
  0x7a   :  { %811 = vmatpush.msrb.mxu1 %v147_v56  ;;  %856 = vmatpush.msrb.mxu3 %v231_v63 }
  0x7b   :  { %768 = vmatpush.msrb.mxu2 %v272_v21  ;;  %726 = vmatpush.msrb.mxu0 %v167_v44  ;;  %v97_v21 = vld [vmem:[%s3286_s1 + $0x98] sm:$0xff] }
  0x7c   :  { %1516 = vmatmul.msk.f32.gmra.mxu0 %vm288_vm4, %v2246_v23  ;;  %812 = vmatpush.msrb.mxu1 %v140_v33 }
  0x7d   :  { %1524 = vmatmul.msk.f32.gmra.mxu2 %vm288_vm4, %v2246_v23  ;;  %727 = vmatpush.msrb.mxu0 %v160_v46 }
  0x7e   :  { %1536 = vmatmul.msk.f32.gmra.mxu3 %vm288_vm4, %v2086_v48  ;;  %508 = vmatmul.f32.gmra.mxu1 %v2243_v24 }
  0x7f   :  { %769 = vmatpush.msrb.mxu2 %v265_v26  ;;  %728 = vmatpush.msrb.mxu0 %v153_v49 }
  0x80   :  { %813 = vmatpush.msrb.mxu1 %v133_v1  ;;  %857 = vmatpush.msrb.mxu3 %v224_v6 }
  0x81   :  { %770 = vmatpush.msrb.mxu2 %v258_v35  ;;  %729 = vmatpush.msrb.mxu0 %v146_v54 }
  0x82   :  { %814 = vmatpush.msrb.mxu1 %v126_v5  ;;  %858 = vmatpush.msrb.mxu3 %v217_v12 }
  0x83   :  { %771 = vmatpush.msrb.mxu2 %v251_v42  ;;  %730 = vmatpush.msrb.mxu0 %v139_v32  ;;  %v84_v42 = vld [vmem:[%s3286_s1 + $0x30] sm:$0xff] }
  0x84   :  { %1517 = vmatmul.msk.f32.gmra.mxu0 %vm288_vm4, %v2293_v43  ;;  %815 = vmatpush.msrb.mxu1 %v119_v9 }
  0x85   :  { %1525 = vmatmul.msk.f32.gmra.mxu2 %vm288_vm4, %v2293_v43  ;;  %731 = vmatpush.msrb.mxu0 %v132_v62 }
  0x86   :  { %1537 = vmatmul.msk.f32.gmra.mxu3 %vm288_vm4, %v2131_v59  ;;  %511 = vmatmul.f32.gmra.mxu1 %v2284_v40 }
  0x87   :  { %772 = vmatpush.msrb.mxu2 %v244_v51  ;;  %732 = vmatpush.msrb.mxu0 %v125_v3 }
  0x88   :  { %816 = vmatpush.msrb.mxu1 %v112_v16  ;;  %859 = vmatpush.msrb.mxu3 %v210_v15 }
  0x89   :  { %773 = vmatpush.msrb.mxu2 %v237_v60  ;;  %733 = vmatpush.msrb.mxu0 %v118_v8 }
  0x8a   :  { %817 = vmatpush.msrb.mxu1 %v105_v20  ;;  %860 = vmatpush.msrb.mxu3 %v203_v19 }
  0x8b   :  { %774 = vmatpush.msrb.mxu2 %v230_v61  ;;  %734 = vmatpush.msrb.mxu0 %v111_v13 }
  0x8c   :  { %1518 = vmatmul.msk.f32.gmra.mxu0 %vm288_vm4, %v2337_v57  ;;  %818 = vmatpush.msrb.mxu1 %v98_v22 }
  0x8d   :  { %1526 = vmatmul.msk.f32.gmra.mxu2 %vm288_vm4, %v2337_v57  ;;  %735 = vmatpush.msrb.mxu0 %v104_v17 }
  0x8e   :  { %1538 = vmatmul.msk.f32.gmra.mxu3 %vm288_vm4, %v2169_v2  ;;  %514 = vmatmul.f32.gmra.mxu1 %v2331_v53 }
  0x8f   :  { %775 = vmatpush.msrb.mxu2 %v223_v4  ;;  %736 = vmatpush.msrb.mxu0 %v97_v21 }
  0x90   :  { %861 = vmatpush.msrb.mxu3 %v196_v27  ;;  %819 = vmatpush.msrb.mxu1 %v91_v30 }
  0x91   :  { %776 = vmatpush.msrb.mxu2 %v216_v7  ;;  %737 = vmatpush.msrb.mxu0 %v90_v29 }
  0x92   :  { %820 = vmatpush.msrb.mxu1 %v84_v42 }
  0x93   :  { %777 = vmatpush.msrb.mxu2 %v209_v14  ;;  %738 = vmatpush.msrb.mxu0 %v83_v31 }
  0x94   :  { %575 = vmatmul.f32.vlgmr.msra.gmra.mxu0 %v2045_v34 }
  0x95   :  { %1539 = vmatmul.msk.f32.vlgmr.msra.gmra.mxu2 %vm288_vm4, %v2202_v11 }
  0x96   :  { %1547 = vmatmul.msk.f32.vlgmr.msra.gmra.mxu3 %vm288_vm4, %v2202_v11  ;;  %657 = vmatmul.f32.vlgmr.msra.gmra.mxu1 %v2045_v34 }
  0x97   :  { %778 = vmatpush.msrb.mxu2 %v202_v18 }
  0x99   :  { %779 = vmatpush.msrb.mxu2 %v195_v25 }
  0x9c   :  { %578 = vmatmul.f32.gmra.mxu0 %v2083_v47 }
  0x9d   :  { %1540 = vmatmul.msk.f32.gmra.mxu2 %vm288_vm4, %v2246_v23 }
  0x9e   :  { %1548 = vmatmul.msk.f32.gmra.mxu3 %vm288_vm4, %v2246_v23  ;;  %660 = vmatmul.f32.gmra.mxu1 %v2083_v47 }
  0xa4   :  { %581 = vmatmul.f32.gmra.mxu0 %v2124_v55 }
  0xa5   :  { %1541 = vmatmul.msk.f32.gmra.mxu2 %vm288_vm4, %v2293_v43 }
  0xa6   :  { %1549 = vmatmul.msk.f32.gmra.mxu3 %vm288_vm4, %v2293_v43  ;;  %663 = vmatmul.f32.gmra.mxu1 %v2124_v55 }
  0xac   :  { %584 = vmatmul.f32.gmra.mxu0 %v2163_v0 }
  0xad   :  { %1542 = vmatmul.msk.f32.gmra.mxu2 %vm288_vm4, %v2337_v57 }
  0xae   :  { %1550 = vmatmul.msk.f32.gmra.mxu3 %vm288_vm4, %v2337_v57  ;;  %666 = vmatmul.f32.gmra.mxu1 %v2163_v0 }
  0xb1   :  { %v2618_v26 = vpop.f32.mrf.mxu0 }
  0xb2   :  { %v383_v28 = vpop.f32.mrf.mxu1 }
  0xb4   :  { %587 = vmatmul.f32.gmra.mxu0 %v2199_v10 }
  0xb5   :  { %1543 = vmatmul.msk.f32.gmra.mxu2 %vm288_vm4, %v2048_v37 }
  0xb6   :  { %1551 = vmatmul.msk.f32.gmra.mxu3 %vm288_vm4, %v2048_v37  ;;  %669 = vmatmul.f32.gmra.mxu1 %v2199_v10 }
  0xb7   :  { %v2638_v36 = vpop.f32.mrf.mxu2 }
  0xb8   :  { %v465_v35 = vpop.f32.mrf.mxu3 }
  0xb9   :  { %v2640_v38 = vpop.f32.mrf.mxu0 }
  0xba   :  { %v386_v41 = vpop.f32.mrf.mxu1 }
  0xbc   :  { %590 = vmatmul.f32.gmra.mxu0 %v2243_v24 }
  0xbd   :  { %1544 = vmatmul.msk.f32.gmra.mxu2 %vm288_vm4, %v2086_v48 }
  0xbe   :  { %1552 = vmatmul.msk.f32.gmra.mxu3 %vm288_vm4, %v2086_v48  ;;  %672 = vmatmul.f32.gmra.mxu1 %v2243_v24 }
  0xbf   :  { %v2651_v44 = vpop.f32.mrf.mxu2 }
  0xc0   :  { %v468_v39 = vpop.f32.mrf.mxu3 }
  0xc1   :  { %v2653_v46 = vpop.f32.mrf.mxu0 }
  0xc3   :  { %v389_v45 = vpop.f32.mrf.mxu1 }
  0xc4   :  { %593 = vmatmul.f32.gmra.mxu0 %v2284_v40 }
  0xc5   :  { %1545 = vmatmul.msk.f32.gmra.mxu2 %vm288_vm4, %v2131_v59 }
  0xc6   :  { %1553 = vmatmul.msk.f32.gmra.mxu3 %vm288_vm4, %v2131_v59  ;;  %675 = vmatmul.f32.gmra.mxu1 %v2284_v40 }
  0xc8   :  { %v2661_v49 = vpop.f32.mrf.mxu2  ;;  %v471_v50 = vpop.f32.mrf.mxu3 }
  0xc9   :  { %v2663_v51 = vpop.f32.mrf.mxu0 }
  0xcb   :  { %v392_v52 = vpop.f32.mrf.mxu1 }
  0xcc   :  { %596 = vmatmul.f32.gmra.mxu0 %v2331_v53 }
  0xcd   :  { %1546 = vmatmul.msk.f32.gmra.mxu2 %vm288_vm4, %v2169_v2 }
  0xce   :  { %1554 = vmatmul.msk.f32.gmra.mxu3 %vm288_vm4, %v2169_v2  ;;  %678 = vmatmul.f32.gmra.mxu1 %v2331_v53 }
  0xd0   :  { %v2671_v54 = vpop.f32.mrf.mxu2 }
  0xd1   :  { %v474_v56 = vpop.f32.mrf.mxu3  ;;  %v342_v60 = vpop.f32.mrf.mxu0 }
  0xd2   :  { %v2673_v58 = vadd.f32 %v383_v28, %v342_v60 }
  0xd3   :  { %v494_v32 = vpop.f32.mrf.mxu1 }
  0xd4   :  { %739 = vmatmul.f32.vlgmr.msrb.gmra.mxu0 %v2045_v34 }
  0xd5   :  { %1555 = vmatmul.msk.f32.vlgmr.msrb.gmra.mxu2 %vm288_vm4, %v2202_v11 }
  0xd6   :  { %1563 = vmatmul.msk.f32.vlgmr.msrb.gmra.mxu3 %vm288_vm4, %v2202_v11  ;;  %821 = vmatmul.f32.vlgmr.msrb.gmra.mxu1 %v2045_v34 }
  0xd8   :  { %v424_v33 = vpop.f32.mrf.mxu2 }
  0xd9   :  { %v2681_v61 = vadd.f32 %v465_v35, %v424_v33  ;;  %v535_v62 = vpop.f32.mrf.mxu3  ;;  %v345_v1 = vpop.f32.mrf.mxu0 }
  0xda   :  { %v2683_v63 = vadd.f32 %v535_v62, %v494_v32  ;;  %v2685_v3 = vadd.f32 %v386_v41, %v345_v1 }
  0xdb   :  { %v497_v4 = vpop.f32.mrf.mxu1 }
  0xdc   :  { %3315 = vst [vmem:[#allocation5_spill] sm:$0xff] %v2683_v63  ;;  %742 = vmatmul.f32.gmra.mxu0 %v2083_v47 }
  0xdd   :  { %1556 = vmatmul.msk.f32.gmra.mxu2 %vm288_vm4, %v2246_v23 }
  0xde   :  { %1564 = vmatmul.msk.f32.gmra.mxu3 %vm288_vm4, %v2246_v23  ;;  %824 = vmatmul.f32.gmra.mxu1 %v2083_v47 }
  0xe0   :  { %v427_v34 = vpop.f32.mrf.mxu2 }
  0xe1   :  { %v2693_v11 = vadd.f32 %v468_v39, %v427_v34  ;;  %v538_v5 = vpop.f32.mrf.mxu3  ;;  %v348_v8 = vpop.f32.mrf.mxu0 }
  0xe2   :  { %v2695_v6 = vadd.f32 %v538_v5, %v497_v4  ;;  %v2697_v7 = vadd.f32 %v389_v45, %v348_v8 }
  0xe3   :  { %v500_v9 = vpop.f32.mrf.mxu1 }
  0xe4   :  { %745 = vmatmul.f32.gmra.mxu0 %v2124_v55 }
  0xe5   :  { %1557 = vmatmul.msk.f32.gmra.mxu2 %vm288_vm4, %v2293_v43 }
  0xe6   :  { %1565 = vmatmul.msk.f32.gmra.mxu3 %vm288_vm4, %v2293_v43  ;;  %827 = vmatmul.f32.gmra.mxu1 %v2124_v55 }
  0xe8   :  { %v430_v47 = vpop.f32.mrf.mxu2 }
  0xe9   :  { %v2705_v23 = vadd.f32 %v471_v50, %v430_v47  ;;  %v541_v12 = vpop.f32.mrf.mxu3  ;;  %v351_v14 = vpop.f32.mrf.mxu0 }
  0xea   :  { %v2707_v13 = vadd.f32 %v541_v12, %v500_v9  ;;  %v2709_v16 = vadd.f32 %v392_v52, %v351_v14 }
  0xeb   :  { %v503_v15 = vpop.f32.mrf.mxu1 }
  0xec   :  { %3316 = vst [vmem:[#allocation6_spill] sm:$0xff] %v2707_v13  ;;  %748 = vmatmul.f32.gmra.mxu0 %v2163_v0 }
  0xed   :  { %3317 = vst [vmem:[#allocation7_spill] sm:$0xff] %v2709_v16  ;;  %1558 = vmatmul.msk.f32.gmra.mxu2 %vm288_vm4, %v2337_v57 }
  0xee   :  { %1566 = vmatmul.msk.f32.gmra.mxu3 %vm288_vm4, %v2337_v57  ;;  %830 = vmatmul.f32.gmra.mxu1 %v2163_v0 }
  0xf0   :  { %v433_v55 = vpop.f32.mrf.mxu2 }
  0xf1   :  { %v2717_v43 = vadd.f32 %v474_v56, %v433_v55  ;;  %v544_v17 = vpop.f32.mrf.mxu3  ;;  %v371_v20 = vpop.f32.mrf.mxu0 }
  0xf2   :  { %v2719_v18 = vadd.f32 %v544_v17, %v503_v15  ;;  %v2722_v19 = vadd.f32 %v371_v20, %v2618_v26 }
  0xf3   :  { %3318 = vst [vmem:[#allocation8_spill] sm:$0xff] %v2717_v43  ;;  %v506_v21 = vpop.f32.mrf.mxu1 }
  0xf4   :  { %3319 = vst [vmem:[#allocation9_spill] sm:$0xff] %v2722_v19  ;;  %751 = vmatmul.f32.gmra.mxu0 %v2199_v10 }
  0xf5   :  { %1559 = vmatmul.msk.f32.gmra.mxu2 %vm288_vm4, %v2048_v37 }
  0xf6   :  { %1567 = vmatmul.msk.f32.gmra.mxu3 %vm288_vm4, %v2048_v37  ;;  %833 = vmatmul.f32.gmra.mxu1 %v2199_v10 }
  0xf8   :  { %v453_v0 = vpop.f32.mrf.mxu2 }
  0xf9   :  { %v2731_v57 = vadd.f32 %v453_v0, %v2638_v36  ;;  %v547_v22 = vpop.f32.mrf.mxu3  ;;  %v374_v26 = vpop.f32.mrf.mxu0 }
  0xfa   :  { %v2733_v25 = vadd.f32 %v547_v22, %v506_v21  ;;  %v2736_v28 = vadd.f32 %v374_v26, %v2640_v38 }
  0xfb   :  { %3320 = vst [vmem:[#allocation10_spill] sm:$0xff] %v2731_v57  ;;  %v509_v27 = vpop.f32.mrf.mxu1 }
  0xfc   :  { %3321 = vst [vmem:[#allocation11_spill] sm:$0xff] %v2736_v28  ;;  %754 = vmatmul.f32.gmra.mxu0 %v2243_v24 }
  0xfd   :  { %1560 = vmatmul.msk.f32.gmra.mxu2 %vm288_vm4, %v2086_v48 }
  0xfe   :  { %1568 = vmatmul.msk.f32.gmra.mxu3 %vm288_vm4, %v2086_v48  ;;  %836 = vmatmul.f32.gmra.mxu1 %v2243_v24 }
 0x100   :  { %v456_v37 = vpop.f32.mrf.mxu2 }
 0x101   :  { %v2745_v10 = vadd.f32 %v456_v37, %v2651_v44  ;;  %v550_v29 = vpop.f32.mrf.mxu3  ;;  %v377_v31 = vpop.f32.mrf.mxu0  ;;  %v961_v37 = vmul.f32 %v2731_v57, %v2731_v57 }
 0x102   :  { %v2747_v30 = vadd.f32 %v550_v29, %v509_v27  ;;  %v2750_v36 = vadd.f32 %v377_v31, %v2653_v46  ;;  %v960_v29 = vmul.f32 %v2722_v19, %v2722_v19  ;;  %v887_v31 = vadd.f32 %v2731_v57, %v2722_v19 }
 0x103   :  { %3322 = vst [vmem:[#allocation12_spill] sm:$0xff] %v2745_v10  ;;  %v512_v35 = vpop.f32.mrf.mxu1  ;;  %v968_v19 = vmul.f32 %v2745_v10, %v2745_v10 }
 0x104   :  { %3323 = vst [vmem:[#allocation13_spill] sm:$0xff] %v2750_v36  ;;  %757 = vmatmul.f32.gmra.mxu0 %v2284_v40 }
 0x105   :  { %1561 = vmatmul.msk.f32.gmra.mxu2 %vm288_vm4, %v2131_v59 }
 0x106   :  { %1569 = vmatmul.msk.f32.gmra.mxu3 %vm288_vm4, %v2131_v59  ;;  %839 = vmatmul.f32.gmra.mxu1 %v2284_v40 }
 0x108   :  { %v459_v48 = vpop.f32.mrf.mxu2 }
 0x109   :  { %v2759_v24 = vadd.f32 %v459_v48, %v2661_v49  ;;  %v553_v38 = vpop.f32.mrf.mxu3  ;;  %v380_v42 = vpop.f32.mrf.mxu0 }
 0x10a   :  { %v2761_v41 = vadd.f32 %v553_v38, %v512_v35  ;;  %v2764_v44 = vadd.f32 %v380_v42, %v2663_v51  ;;  %v1016_v38 = vadd.f32 %v961_v37, %v960_v29  ;;  %v897_v37 = vadd.f32 %v2745_v10, %v2736_v28 }
 0x10b   :  { %3324 = vst [vmem:[#allocation14_spill] sm:$0xff] %v2759_v24  ;;  %v515_v39 = vpop.f32.mrf.mxu1 }
 0x10c   :  { %760 = vmatmul.f32.gmra.mxu0 %v2331_v53 }
 0x10d   :  { %1562 = vmatmul.msk.f32.gmra.mxu2 %vm288_vm4, %v2169_v2 }
 0x10e   :  { %1570 = vmatmul.msk.f32.gmra.mxu3 %vm288_vm4, %v2169_v2  ;;  %842 = vmatmul.f32.gmra.mxu1 %v2331_v53 }
 0x110   :  { %v462_v59 = vpop.f32.mrf.mxu2 }
 0x111   :  { %v2773_v40 = vadd.f32 %v462_v59, %v2671_v54  ;;  %v556_v46 = vpop.f32.mrf.mxu3  ;;  %v576_v49 = vpop.f32.mrf.mxu0  ;;  %v962_v59 = vmul.f32 %v2683_v63, %v2683_v63 }
 0x112   :  { %v2775_v45 = vadd.f32 %v556_v46, %v515_v39  ;;  %v888_v46 = vadd.f32 %v887_v31, %v2683_v63 }
 0x113   :  { %v658_v50 = vpop.f32.mrf.mxu1 }
 0x114   :  { %3325 = vst [vmem:[#allocation15_spill] sm:$0xff] %v2775_v45 }
 0x118   :  { %v617_v51 = vpop.f32.mrf.mxu2 }
 0x119   :  { %v699_v52 = vpop.f32.mrf.mxu3  ;;  %v579_v56 = vpop.f32.mrf.mxu0  ;;  %v2827_v35 = vadd.f32 %v617_v51, %v576_v49  ;;  %v1017_v51 = vadd.f32 %v1016_v38, %v962_v59  ;;  %v967_v38 = vmul.f32 %v2736_v28, %v2736_v28 }
 0x11a   :  { %v2838_v45 = vadd.f32 %v699_v52, %v658_v50 }
 0x11b   :  { %v661_v60 = vpop.f32.mrf.mxu1  ;;  %v889_v49 = vadd.f32 %v888_v46, %v2827_v35 }
 0x11c   :  { %3328 = vst [vmem:[#allocation18_spill] sm:$0xff] %v2838_v45  ;;  %v964_v29 = vmul.f32 %v2838_v45, %v2838_v45 }
 0x11d   :  { %v890_v52 = vadd.f32 %v889_v49, %v2838_v45  ;;  %v969_v45 = vmul.f32 %v2695_v6, %v2695_v6 }
 0x120   :  { %v620_v32 = vpop.f32.mrf.mxu2 }
 0x121   :  { %v702_v33 = vpop.f32.mrf.mxu3  ;;  %v2777_v62 = vpop.f32.mrf.mxu0  ;;  %v2847_v63 = vadd.f32 %v620_v32, %v579_v56 }
 0x123   :  { %v2779_v2 = vpop.f32.mrf.mxu1 }
 0x128   :  { %v2781_v53 = vpop.f32.mrf.mxu2 }
 0x129   :  { %v2783_v1 = vpop.f32.mrf.mxu3  ;;  %v2785_v54 = vpop.f32.mrf.mxu0 }
 0x12b   :  { %v2787_v4 = vpop.f32.mrf.mxu1 }
 0x130   :  { %v2789_v34 = vpop.f32.mrf.mxu2 }
 0x131   :  { %v2791_v5 = vpop.f32.mrf.mxu3  ;;  %v2793_v8 = vpop.f32.mrf.mxu0 }
 0x133   :  { %v2795_v9 = vpop.f32.mrf.mxu1 }
 0x138   :  { %v2797_v47 = vpop.f32.mrf.mxu2 }
 0x139   :  { %v2799_v12 = vpop.f32.mrf.mxu3  ;;  %v2801_v14 = vpop.f32.mrf.mxu0 }
 0x13b   :  { %v2803_v15 = vpop.f32.mrf.mxu1 }
 0x140   :  { %v2805_v55 = vpop.f32.mrf.mxu2 }
 0x141   :  { %v2807_v17 = vpop.f32.mrf.mxu3  ;;  %v2809_v20 = vpop.f32.mrf.mxu0 }
 0x143   :  { %v2811_v21 = vpop.f32.mrf.mxu1 }
 0x148   :  { %v2813_v0 = vpop.f32.mrf.mxu2 }
 0x149   :  { %v2815_v22 = vpop.f32.mrf.mxu3  ;;  %v2817_v26 = vpop.f32.mrf.mxu0 }
 0x14b   :  { %v2819_v27 = vpop.f32.mrf.mxu1 }
 0x14c   :  { %3326 = vst [vmem:[#allocation16_spill] sm:$0xff] %v2819_v27  ;;  %v963_v27 = vmul.f32 %v2827_v35, %v2827_v35 }
 0x14e   :  { %v1018_v57 = vadd.f32 %v1017_v51, %v963_v27  ;;  %v898_v27 = vadd.f32 %v897_v37, %v2695_v6 }
 0x150   :  { %v2829_v48 = vpop.f32.mrf.mxu2  ;;  %v1019_v32 = vadd.f32 %v1018_v57, %v964_v29  ;;  %v970_v57 = vmul.f32 %v2847_v63, %v2847_v63 }
 0x151   :  { %v2831_v42 = vpop.f32.mrf.mxu3  ;;  %v740_v39 = vpop.f32.mrf.mxu0 }
 0x152   :  { %3327 = vst [vmem:[#allocation17_spill] sm:$0xff] %v2831_v42 }
 0x153   :  { %v822_v16 = vpop.f32.mrf.mxu1 }
 0x158   :  { %v781_v31 = vpop.f32.mrf.mxu2 }
 0x159   :  { %v2849_v42 = vadd.f32 %v781_v31, %v740_v39  ;;  %v863_v50 = vpop.f32.mrf.mxu3  ;;  %v743_v46 = vpop.f32.mrf.mxu0  ;;  %v1025_v39 = vadd.f32 %v968_v19, %v967_v38  ;;  %v906_v19 = vadd.f32 %v2759_v24, %v2750_v36  ;;  %v975_v38 = vmul.f32 %v2759_v24, %v2759_v24 }
 0x15a   :  { %v2854_v59 = vadd.f32 %v863_v50, %v822_v16  ;;  %v899_v16 = vadd.f32 %v898_v27, %v2847_v63  ;;  %v2865_v50 = vadd.f32 %v702_v33, %v661_v60 }
 0x15b   :  { %v891_v51 = vadd.f32 %v890_v52, %v2849_v42  ;;  %v825_v10 = vpop.f32.mrf.mxu1  ;;  %v965_v56 = vmul.f32 %v2849_v42, %v2849_v42  ;;  %v1026_v33 = vadd.f32 %v1025_v39, %v969_v45  ;;  %v907_v39 = vadd.f32 %v906_v19, %v2707_v13 }
 0x15c   :  { %v893_v49 = vsel %vm892_vm5, %v2854_v59, 0.0  ;;  %v966_v31 = vmul.f32 %v2854_v59, %v2854_v59  ;;  %v900_v27 = vadd.f32 %v899_v16, %v2865_v50  ;;  %v971_v45 = vmul.f32 %v2865_v50, %v2865_v50 }
 0x15d   :  { %v894_v28 = vadd.f32 %v893_v49, %v891_v51  ;;  %v1020_v37 = vadd.f32 %v1019_v32, %v965_v56  ;;  %v2879_v51 = vadd.f32 %v2781_v53, %v2777_v62  ;;  %v974_v49 = vmul.f32 %v2750_v36, %v2750_v36 }
 0x15e   :  { %v1021_v52 = vsel %vm892_vm5, %v966_v31, 0.0  ;;  %v983_v36 = vmul.f32 %v2719_v18, %v2719_v18 }
 0x15f   :  { %895 = vadd.xlane.f32.xlu0 %v894_v28  ;;  %v1022_v29 = vadd.f32 %v1021_v52, %v1020_v37  ;;  %3329 = vst [vmem:[#allocation19_spill] sm:$0xff] %v2879_v51  ;;  %v1027_v37 = vadd.f32 %v1026_v33, %v970_v57  ;;  %v1034_v53 = vadd.f32 %v975_v38, %v974_v49 }
 0x160   :  { %v784_v60 = vpop.f32.mrf.mxu2  ;;  %v2898_v57 = vadd.f32 %v2783_v1, %v2779_v2  ;;  %v981_v33 = vmul.f32 %v2764_v44, %v2764_v44  ;;  %v2912_v2 = vadd.f32 %v2789_v34, %v2785_v54 }
 0x161   :  { %v2881_v56 = vadd.f32 %v784_v60, %v743_v46  ;;  %v866_v32 = vpop.f32.mrf.mxu3  ;;  %1023 = vadd.xlane.f32.xlu2 %v1022_v29  ;;  %v746_v31 = vpop.f32.mrf.mxu0  ;;  %v982_v46 = vmul.f32 %v2773_v40, %v2773_v40  ;;  %v976_v60 = vmul.f32 %v2707_v13, %v2707_v13  ;;  %v1028_v1 = vadd.f32 %v1027_v37, %v971_v45 }
 0x162   :  { %v2885_v28 = vadd.f32 %v866_v32, %v825_v10  ;;  %v908_v10 = vadd.f32 %v907_v39, %v2879_v51  ;;  %v2928_v45 = vadd.f32 %v2791_v5, %v2787_v4  ;;  %v988_v4 = vmul.f32 %v2673_v58, %v2673_v58 }
 0x163   :  { %v901_v16 = vadd.f32 %v900_v27, %v2881_v56  ;;  %v828_v62 = vpop.f32.mrf.mxu1  ;;  %v972_v29 = vmul.f32 %v2881_v56, %v2881_v56  ;;  %v977_v27 = vmul.f32 %v2879_v51, %v2879_v51  ;;  %v1035_v32 = vadd.f32 %v1034_v53, %v976_v60 }
 0x164   :  { %3330 = vst [vmem:[#allocation20_spill] sm:$0xff] %v2885_v28  ;;  %v902_v52 = vsel %vm892_vm5, %v2885_v28, 0.0  ;;  %v973_v38 = vmul.f32 %v2885_v28, %v2885_v28  ;;  %v1043_v39 = vadd.f32 %v982_v46, %v981_v33  ;;  %v909_v13 = vadd.f32 %v908_v10, %v2898_v57 }
 0x165   :  { %v903_v19 = vadd.f32 %v902_v52, %v901_v16  ;;  %v1029_v24 = vadd.f32 %v1028_v1, %v972_v29  ;;  %v978_v51 = vmul.f32 %v2898_v57, %v2898_v57  ;;  %v1036_v37 = vadd.f32 %v1035_v32, %v977_v27 }
 0x166   :  { %v1030_v54 = vsel %vm892_vm5, %v973_v38, 0.0  ;;  %v989_v10 = vmul.f32 %v2681_v61, %v2681_v61  ;;  %v985_v1 = vmul.f32 %v2928_v45, %v2928_v45  ;;  %v990_v32 = vmul.f32 %v2733_v25, %v2733_v25 }
 0x167   :  { %904 = vadd.xlane.f32.xlu0 %v903_v19  ;;  %v1044_v19 = vadd.f32 %v1043_v39, %v983_v36  ;;  %v1031_v33 = vadd.f32 %v1030_v54, %v1029_v24  ;;  %v1037_v36 = vadd.f32 %v1036_v37, %v978_v51  ;;  %v924_v24 = vadd.f32 %v2681_v61, %v2673_v58 }
 0x168   :  { %v787_v49 = vpop.f32.mrf.mxu2  ;;  %v1052_v39 = vadd.f32 %v989_v10, %v988_v4  ;;  %v2960_v51 = vadd.f32 %v2799_v12, %v2795_v9 }
 0x169   :  { %v2914_v16 = vadd.f32 %v787_v49, %v746_v31  ;;  %v869_v52 = vpop.f32.mrf.mxu3  ;;  %v749_v34 = vpop.f32.mrf.mxu0  ;;  %v984_v31 = vmul.f32 %v2912_v2, %v2912_v2  ;;  %v925_v10 = vadd.f32 %v924_v24, %v2733_v25 }
 0x16a   :  { %v2921_v28 = vadd.f32 %v869_v52, %v828_v62  ;;  %v915_v62 = vadd.f32 %v2773_v40, %v2764_v44  ;;  %v992_v24 = vmul.f32 %v2960_v51, %v2960_v51 }
 0x16b   :  { %v910_v53 = vadd.f32 %v909_v13, %v2914_v16  ;;  %v831_v46 = vpop.f32.mrf.mxu1  ;;  %v979_v60 = vmul.f32 %v2914_v16, %v2914_v16  ;;  %v2943_v13 = vadd.f32 %v2797_v47, %v2793_v8  ;;  %v1045_v27 = vadd.f32 %v1044_v19, %v984_v31 }
 0x16c   :  { %v911_v29 = vsel %vm892_vm5, %v2921_v28, 0.0  ;;  %v980_v5 = vmul.f32 %v2921_v28, %v2921_v28  ;;  %v916_v8 = vadd.f32 %v915_v62, %v2719_v18 }
 0x16d   :  { %v912_v38 = vadd.f32 %v911_v29, %v910_v53  ;;  %v1038_v54 = vadd.f32 %v1037_v36, %v979_v60  ;;  %v991_v31 = vmul.f32 %v2943_v13, %v2943_v13  ;;  %v1046_v60 = vadd.f32 %v1045_v27, %v985_v1 }
 0x16e   :  { %v1039_v53 = vsel %vm892_vm5, %v980_v5, 0.0  ;;  %v917_v62 = vadd.f32 %v916_v8, %v2912_v2  ;;  %v926_v12 = vadd.f32 %v925_v10, %v2943_v13  ;;  %v995_v5 = vmul.f32 %v2685_v3, %v2685_v3 }
 0x16f   :  { %913 = vadd.xlane.f32.xlu1 %v912_v38  ;;  %1032 = vadd.xlane.f32.xlu0 %v1031_v33  ;;  %v996_v38 = vmul.f32 %v2693_v11, %v2693_v11  ;;  %v1053_v33 = vadd.f32 %v1052_v39, %v990_v32  ;;  %v2982_v32 = vadd.f32 %v2805_v55, %v2801_v14 }
 0x170   :  { %v790_v49 = vpop.f32.mrf.mxu2  ;;  %v918_v1 = vadd.f32 %v917_v62, %v2928_v45  ;;  %v933_v39 = vadd.f32 %v2693_v11, %v2685_v3 }
 0x171   :  { %v2954_v47 = vadd.f32 %v790_v49, %v749_v34  ;;  %v872_v52 = vpop.f32.mrf.mxu3  ;;  %v752_v29 = vpop.f32.mrf.mxu0  ;;  %v1054_v36 = vadd.f32 %v1053_v33, %v991_v31  ;;  %v1061_v8 = vadd.f32 %v996_v38, %v995_v5  ;;  %v927_v31 = vadd.f32 %v926_v12, %v2960_v51 }
 0x172   :  { %v2962_v37 = vadd.f32 %v872_v52, %v831_v46  ;;  %v1040_v46 = vadd.f32 %v1039_v53, %v1038_v54  ;;  %v997_v54 = vmul.f32 %v2747_v30, %v2747_v30  ;;  %v934_v14 = vadd.f32 %v933_v39, %v2747_v30 }
 0x173   :  { %v986_v34 = vmul.f32 %v2954_v47, %v2954_v47  ;;  %v834_v19 = vpop.f32.mrf.mxu1  ;;  %v919_v62 = vadd.f32 %v918_v1, %v2954_v47  ;;  %v1055_v38 = vadd.f32 %v1054_v36, %v992_v24  ;;  %v998_v33 = vmul.f32 %v2982_v32, %v2982_v32 }
 0x174   :  { %v987_v9 = vmul.f32 %v2962_v37, %v2962_v37  ;;  %v1062_v5 = vadd.f32 %v1061_v8, %v997_v54  ;;  %v935_v36 = vadd.f32 %v934_v14, %v2982_v32  ;;  %v1002_v54 = vmul.f32 %v2697_v7, %v2697_v7 }
 0x175   :  { %v1047_v4 = vadd.f32 %v1046_v60, %v986_v34  ;;  %v920_v34 = vsel %vm892_vm5, %v2962_v37, 0.0 }
 0x176   :  { %v1048_v27 = vsel %vm892_vm5, %v987_v9, 0.0  ;;  %v921_v24 = vadd.f32 %v920_v34, %v919_v62 }
 0x177   :  { %1041 = vadd.xlane.f32.xlu1 %v1040_v46  ;;  %v1049_v49 = vadd.f32 %v1048_v27, %v1047_v4 }
 0x178   :  { %v793_v52 = vpop.f32.mrf.mxu2 }
 0x179   :  { %v2989_v53 = vadd.f32 %v793_v52, %v752_v29  ;;  %v875_v10 = vpop.f32.mrf.mxu3  ;;  %1050 = vadd.xlane.f32.xlu2 %v1049_v49  ;;  %v755_v60 = vpop.f32.mrf.mxu0  ;;  %v3001_v29 = vadd.f32 %v2807_v17, %v2803_v15  ;;  %v1003_v15 = vmul.f32 %v2705_v23, %v2705_v23  ;;  %v3015_v17 = vadd.f32 %v2813_v0, %v2809_v20 }
 0x17a   :  { %v2993_v55 = vadd.f32 %v875_v10, %v834_v19  ;;  %v1063_v49 = vadd.f32 %v1062_v5, %v998_v33  ;;  %v942_v20 = vadd.f32 %v2705_v23, %v2697_v7  ;;  %v3033_v33 = vadd.f32 %v2815_v22, %v2811_v21 }
 0x17b   :  { %v993_v9 = vmul.f32 %v2989_v53, %v2989_v53  ;;  %v837_v12 = vpop.f32.mrf.mxu1  ;;  %v928_v46 = vadd.f32 %v927_v31, %v2989_v53  ;;  %v999_v39 = vmul.f32 %v3001_v29, %v3001_v29  ;;  %v1004_v31 = vmul.f32 %v2761_v41, %v2761_v41 }
 0x17c   :  { %v929_v19 = vsel %vm892_vm5, %v2993_v55, 0.0  ;;  %v994_v4 = vmul.f32 %v2993_v55, %v2993_v55  ;;  %v936_v0 = vadd.f32 %v935_v36, %v3001_v29  ;;  %v1070_v34 = vadd.f32 %v1003_v15, %v1002_v54 }
 0x17d   :  { %v1056_v27 = vadd.f32 %v1055_v38, %v993_v9  ;;  %v930_v52 = vadd.f32 %v929_v19, %v928_v46  ;;  %v1005_v38 = vmul.f32 %v3015_v17, %v3015_v17  ;;  %v943_v46 = vadd.f32 %v942_v20, %v2761_v41 }
 0x17e   :  { %v1057_v1 = vsel %vm892_vm5, %v994_v4, 0.0  ;;  %v1071_v5 = vadd.f32 %v1070_v34, %v1004_v31  ;;  %v1010_v15 = vmul.f32 %v2717_v43, %v2717_v43  ;;  %v3332_v31 = vld [vmem:[#allocation7_spill] sm:$0xff] }
 0x17f   :  { %922 = vadd.xlane.f32.xlu1 %v921_v24  ;;  %v1058_v8 = vadd.f32 %v1057_v1, %v1056_v27  ;;  %v944_v21 = vadd.f32 %v943_v46, %v3015_v17  ;;  %v951_v20 = vadd.f32 %v2717_v43, %v3332_v31 }
 0x180   :  { %v796_v10 = vpop.f32.mrf.mxu2  ;;  %v1072_v1 = vadd.f32 %v1071_v5, %v1005_v38 }
 0x181   :  { %v3027_v62 = vadd.f32 %v796_v10, %v755_v60  ;;  %v878_v14 = vpop.f32.mrf.mxu3  ;;  %931 = vadd.xlane.f32.xlu2 %v930_v52  ;;  %1059 = vadd.xlane.f32.xlu0 %v1058_v8  ;;  %v1064_v60 = vadd.f32 %v1063_v49, %v999_v39  ;;  %v758_v36 = vpop.f32.mrf.mxu0  ;;  %v1006_v49 = vmul.f32 %v3033_v33, %v3033_v33 }
 0x182   :  { %v3035_v9 = vadd.f32 %v878_v14, %v837_v12  ;;  %v3053_v52 = vadd.f32 %v2829_v48, %v2817_v26  ;;  %v1009_v10 = vmul.f32 %v3332_v31, %v3332_v31  ;;  %v3333_v14 = vld [vmem:[#allocation15_spill] sm:$0xff]  ;;  %v945_v38 = vadd.f32 %v944_v21, %v3033_v33  ;;  %v1211_v31 = vld [vmem:[%s3288_s3 + $0x18] sm:$0xff] }
 0x183   :  { %v1000_v19 = vmul.f32 %v3027_v62, %v3027_v62  ;;  %v937_v4 = vadd.f32 %v936_v0, %v3027_v62  ;;  %v840_v22 = vpop.f32.mrf.mxu1  ;;  %v1011_v34 = vmul.f32 %v3333_v14, %v3333_v14  ;;  %v952_v48 = vadd.f32 %v951_v20, %v3333_v14 }
 0x184   :  { %v1001_v24 = vmul.f32 %v3035_v9, %v3035_v9  ;;  %v938_v27 = vsel %vm892_vm5, %v3035_v9, 0.0  ;;  %3331 = vst [vmem:[#allocation21_spill] sm:$0xff] %v3053_v52  ;;  %v1079_v26 = vadd.f32 %v1010_v15, %v1009_v10  ;;  %v1012_v5 = vmul.f32 %v3053_v52, %v3053_v52 }
 0x185   :  { %v1065_v12 = vadd.f32 %v1064_v60, %v1000_v19  ;;  %v939_v54 = vadd.f32 %v938_v27, %v937_v4  ;;  %v1073_v4 = vadd.f32 %v1072_v1, %v1006_v49  ;;  %v3337_v27 = vld [vmem:[#allocation17_spill] sm:$0xff]  ;;  %v953_v1 = vadd.f32 %v952_v48, %v3053_v52 }
 0x186   :  { %v1066_v39 = vsel %vm892_vm5, %v1001_v24, 0.0  ;;  %v3336_v24 = vld [vmem:[#allocation16_spill] sm:$0xff] }
 0x187   :  { %v1067_v8 = vadd.f32 %v1066_v39, %v1065_v12  ;;  %v3071_v12 = vadd.f32 %v3337_v27, %v3336_v24  ;;  %v1080_v39 = vadd.f32 %v1079_v26, %v1011_v34 }
 0x188   :  { %v799_v0 = vpop.f32.mrf.mxu2 }
 0x189   :  { %v3062_v46 = vadd.f32 %v799_v0, %v758_v36  ;;  %v881_v19 = vpop.f32.mrf.mxu3  ;;  %1068 = vadd.xlane.f32.xlu1 %v1067_v8  ;;  %940 = vadd.xlane.f32.xlu2 %v939_v54  ;;  %3338 = vst [vmem:[#allocation16_spill] sm:$0xff] %v3071_v12  ;;  %v761_v54 = vpop.f32.mrf.mxu0  ;;  %v1081_v20 = vadd.f32 %v1080_v39, %v1012_v5 }
 0x18a   :  { %v3065_v60 = vadd.f32 %v881_v19, %v840_v22  ;;  %v1013_v0 = vmul.f32 %v3071_v12, %v3071_v12  ;;  %v954_v27 = vadd.f32 %v953_v1, %v3071_v12 }
 0x18b   :  { %3334 = vst [vmem:[#allocation22_spill] sm:$0xff] %v3062_v46  ;;  %v1007_v36 = vmul.f32 %v3062_v46, %v3062_v46  ;;  %v946_v21 = vadd.f32 %v945_v38, %v3062_v46  ;;  %v843_v38 = vpop.f32.mrf.mxu1 }
 0x18c   :  { %3335 = vst [vmem:[#allocation23_spill] sm:$0xff] %v3065_v60  ;;  %v947_v15 = vsel %vm892_vm5, %v3065_v60, 0.0  ;;  %v1008_v22 = vmul.f32 %v3065_v60, %v3065_v60  ;;  %v1082_v5 = vadd.f32 %v1081_v20, %v1013_v0 }
 0x18d   :  { %v948_v49 = vadd.f32 %v947_v15, %v946_v21  ;;  %v1074_v8 = vadd.f32 %v1073_v4, %v1007_v36 }
 0x18e   :  { %v1075_v10 = vsel %vm892_vm5, %v1008_v22, 0.0 }
 0x18f   :  { %949 = vadd.xlane.f32.xlu0 %v948_v49  ;;  %v1076_v19 = vadd.f32 %v1075_v10, %v1074_v8  ;;  %v1652_v49 = vmov 0  }
 0x190   :  { %v802_v24 = vpop.f32.mrf.mxu2  ;;  %1603 = vset.pattern.permute.xlu1 %v1652_v49  ;;  %1604 = vset.pattern.permute.xlu2 %v1652_v49 }
 0x191   :  { %v3085_v14 = vadd.f32 %v802_v24, %v761_v54  ;;  %v884_v34 = vpop.f32.mrf.mxu3  ;;  %1077 = vadd.xlane.f32.xlu2 %v1076_v19  ;;  %1605 = vset.pattern.permute.xlu0 %v1652_v49 }
 0x192   :  { %v3087_v26 = vadd.f32 %v884_v34, %v843_v38 }
 0x193   :  { %3339 = vst [vmem:[#allocation17_spill] sm:$0xff] %v3085_v14  ;;  %v1014_v48 = vmul.f32 %v3085_v14, %v3085_v14  ;;  %v955_v4 = vadd.f32 %v954_v27, %v3085_v14 }
 0x194   :  { %3340 = vst [vmem:[#allocation24_spill] sm:$0xff] %v3087_v26  ;;  %v956_v36 = vsel %vm892_vm5, %v3087_v26, 0.0  ;;  %v1015_v21 = vmul.f32 %v3087_v26, %v3087_v26  ;;  %v1224_v26 = vld [vmem:[%s3289_s4] sm:$0xff] }
 0x195   :  { %v957_v15 = vadd.f32 %v956_v36, %v955_v4  ;;  %v1083_v22 = vadd.f32 %v1082_v5, %v1014_v48 }
 0x196   :  { %v1084_v39 = vsel %vm892_vm5, %v1015_v21, 0.0 }
 0x197   :  { %958 = vadd.xlane.f32.xlu1 %v957_v15  ;;  %v1085_v1 = vadd.f32 %v1084_v39, %v1083_v22 }
 0x199   :  { %1086 = vadd.xlane.f32.xlu0 %v1085_v1 }
 0x1d2   :  { %v896_v8 = vpop.xlane.xlu0 %895 }
 0x1d3   :  { %v1088_v54 = vmul.f32 0.0012755102, %v896_v8 }
 0x1d4   :  { %v1024_v10 = vpop.xlane.xlu2 %1023 }
 0x1d5   :  { %v1104_v20 = vmul.f32 %v1088_v54, %v1088_v54  ;;  %v1096_v0 = vmul.f32 0.0012755102, %v1024_v10 }
 0x1d7   :  { %v1112_v38 = vsub.f32 %v1096_v0, %v1104_v20  ;;  %v1208_v0 = vld [vmem:[%s3288_s3] sm:$0xff] }
 0x1d9   :  { %v1120_v19 = vadd.f32 0.001, %v1112_v38 }
 0x1da   :  { %v905_v24 = vpop.xlane.xlu0 %904 }
 0x1db   :  { %1610 = vrsqrt.f32 %v1120_v19  ;;  %v3097_v27 = vmul.f32 0.0012755102, %v905_v24  ;;  %vm1134_vm7 = vweird.f32 %v1120_v19 }
 0x1dd   :  { %v1105_v36 = vmul.f32 %v3097_v27, %v3097_v27 }
 0x1e1   :  { %v1611_v34 = vpop.eup %1610 }
 0x1e2   :  { %v1129_v48 = vmul.f32 %v1611_v34, %v1120_v19  ;;  %v914_v4 = vpop.xlane.xlu1 %913  ;;  %v1033_v5 = vpop.xlane.xlu0 %1032  ;;  %vm1135_vm6 = vweird.f32 %v1611_v34 }
 0x1e3   :  { %v1097_v21 = vmul.f32 0.0012755102, %v1033_v5  ;;  %v3101_v1 = vmul.f32 0.0012755102, %v914_v4  ;;  %vm1136_vm8 = vmor %vm1134_vm7, %vm1135_vm6 }
 0x1e4   :  { %v1130_v15 = vmul.f32 %v1611_v34, %v1129_v48 }
 0x1e5   :  { %v1113_v22 = vsub.f32 %v1097_v21, %v1105_v36  ;;  %v1106_v38 = vmul.f32 %v3101_v1, %v3101_v1 }
 0x1e6   :  { %v1131_v39 = vmul.f32 0.5, %v1130_v15 }
 0x1e7   :  { %v1121_v49 = vadd.f32 0.001, %v1113_v22 }
 0x1e8   :  { %v1132_v8 = vsub.f32 1.5, %v1131_v39 }
 0x1e9   :  { %1612 = vrsqrt.f32 %v1121_v49  ;;  %vm1144_vm10 = vweird.f32 %v1121_v49 }
 0x1ea   :  { %v1042_v10 = vpop.xlane.xlu1 %1041  ;;  %v1133_v20 = vmul.f32 %v1611_v34, %v1132_v8 }
 0x1eb   :  { %v1098_v24 = vmul.f32 0.0012755102, %v1042_v10 }
 0x1ec   :  { %v1051_v48 = vpop.xlane.xlu2 %1050  ;;  %v1137_v5 = vsel %vm1136_vm8, %v1611_v34, %v1133_v20 }
 0x1ed   :  { %v1114_v4 = vsub.f32 %v1098_v24, %v1106_v38  ;;  %v1216_v36 = vmul.f32 %v1208_v0, %v1137_v5  ;;  %v1099_v34 = vmul.f32 0.0012755102, %v1051_v48  ;;  %v1209_v48 = vld [vmem:[%s3288_s3 + $0x8] sm:$0xff] }
 0x1ef   :  { %v1613_v21 = vpop.eup %1612  ;;  %v1122_v15 = vadd.f32 0.001, %v1114_v4  ;;  %1250 = vperm.xlu1 %1603, %v1216_v36   ;;  %v1232_v19 = vmul.f32 %v1216_v36, %v1088_v54 }
 0x1f0   :  { %v1139_v22 = vmul.f32 %v1613_v21, %v1121_v49  ;;  %vm1145_vm9 = vweird.f32 %v1613_v21 }
 0x1f1   :  { %1614 = vrsqrt.f32 %v1122_v15  ;;  %v1240_v38 = vsub.f32 %v1224_v26, %v1232_v19  ;;  %vm1146_vm11 = vmor %vm1144_vm10, %vm1145_vm9  ;;  %vm1154_vm13 = vweird.f32 %v1122_v15 }
 0x1f2   :  { %v1140_v39 = vmul.f32 %v1613_v21, %v1139_v22  ;;  %v923_v8 = vpop.xlane.xlu1 %922 }
 0x1f3   :  { %v3111_v14 = vmul.f32 0.0012755102, %v923_v8 }
 0x1f4   :  { %v1141_v10 = vmul.f32 0.5, %v1140_v39  ;;  %v932_v12 = vpop.xlane.xlu2 %931  ;;  %v1060_v52 = vpop.xlane.xlu0 %1059 }
 0x1f5   :  { %v1107_v20 = vmul.f32 %v3111_v14, %v3111_v14  ;;  %v3115_v0 = vmul.f32 0.0012755102, %v932_v12  ;;  %v1100_v36 = vmul.f32 0.0012755102, %v1060_v52 }
 0x1f6   :  { %v1142_v24 = vsub.f32 1.5, %v1141_v10 }
 0x1f7   :  { %v1615_v54 = vpop.eup %1614  ;;  %v1115_v5 = vsub.f32 %v1099_v34, %v1107_v20  ;;  %v1108_v4 = vmul.f32 %v3115_v0, %v3115_v0  ;;  %1346 = vperm.xlu1 %1603, %v1240_v38   ;;  %v1225_v38 = vld [vmem:[%s3289_s4 + $0x8] sm:$0xff] }
 0x1f8   :  { %v1149_v22 = vmul.f32 %v1615_v54, %v1122_v15  ;;  %v1143_v39 = vmul.f32 %v1613_v21, %v1142_v24  ;;  %vm1155_vm12 = vweird.f32 %v1615_v54 }
 0x1f9   :  { %v1123_v8 = vadd.f32 0.001, %v1115_v5  ;;  %v1116_v12 = vsub.f32 %v1100_v36, %v1108_v4  ;;  %vm1156_vm14 = vmor %vm1154_vm13, %vm1155_vm12 }
 0x1fa   :  { %v1150_v26 = vmul.f32 %v1615_v54, %v1149_v22  ;;  %v1147_v19 = vsel %vm1146_vm11, %v1613_v21, %v1143_v39  ;;  %v1210_v39 = vld [vmem:[%s3288_s3 + $0x10] sm:$0xff] }
 0x1fb   :  { %1616 = vrsqrt.f32 %v1123_v8  ;;  %v3122_v10 = vadd.f32 0.001, %v1116_v12  ;;  %v1217_v34 = vmul.f32 %v1209_v48, %v1147_v19  ;;  %vm1164_vm0 = vweird.f32 %v1123_v8 }
 0x1fc   :  { %v1151_v20 = vmul.f32 0.5, %v1150_v26  ;;  %v1069_v43 = vpop.xlane.xlu1 %1068  ;;  %v941_v52 = vpop.xlane.xlu2 %940 }
 0x1fd   :  { %1618 = vrsqrt.f32 %v3122_v10  ;;  %v3125_v49 = vmul.f32 0.0012755102, %v941_v52  ;;  %1255 = vperm.xlu2 %1604, %v1217_v34   ;;  %v1233_v21 = vmul.f32 %v1217_v34, %v3097_v27  ;;  %v1101_v5 = vmul.f32 0.0012755102, %v1069_v43 }
 0x1fe   :  { %v1152_v24 = vsub.f32 1.5, %v1151_v20  ;;  %vm1174_vm3 = vweird.f32 %v3122_v10 }
 0x1ff   :  { %v1109_v4 = vmul.f32 %v3125_v49, %v3125_v49  ;;  %v1241_v22 = vsub.f32 %v1225_v38, %v1233_v21 }
 0x200   :  { %v1153_v36 = vmul.f32 %v1615_v54, %v1152_v24 }
 0x201   :  { %v1617_v48 = vpop.eup %1616  ;;  %v1117_v12 = vsub.f32 %v1101_v5, %v1109_v4  ;;  %1351 = vperm.xlu0 %1605, %v1241_v22  }
 0x202   :  { %v1159_v26 = vmul.f32 %v1617_v48, %v1123_v8  ;;  %v950_v19 = vpop.xlane.xlu0 %949  ;;  %v1157_v20 = vsel %vm1156_vm14, %v1615_v54, %v1153_v36  ;;  %v1226_v54 = vld [vmem:[%s3289_s4 + $0x10] sm:$0xff]  ;;  %vm1165_vm15 = vweird.f32 %v1617_v48  ;;  %v1212_v8 = vld [vmem:[%s3288_s3 + $0x20] sm:$0xff] }
 0x203   :  { %v1619_v52 = vpop.eup %1618  ;;  %v3136_v27 = vadd.f32 0.001, %v1117_v12  ;;  %v3138_v43 = vmul.f32 0.0012755102, %v950_v19  ;;  %v1218_v34 = vmul.f32 %v1210_v39, %v1157_v20  ;;  %vm1166_vm2 = vmor %vm1164_vm0, %vm1165_vm15 }
 0x204   :  { %v1160_v24 = vmul.f32 %v1617_v48, %v1159_v26  ;;  %v1169_v15 = vmul.f32 %v1619_v52, %v3122_v10  ;;  %v1078_v38 = vpop.xlane.xlu2 %1077  ;;  %vm1175_vm1 = vweird.f32 %v1619_v52 }
 0x205   :  { %1620 = vrsqrt.f32 %v3136_v27  ;;  %v1110_v21 = vmul.f32 %v3138_v43, %v3138_v43  ;;  %v1102_v5 = vmul.f32 0.0012755102, %v1078_v38  ;;  %v1234_v22 = vmul.f32 %v1218_v34, %v3101_v1  ;;  %vm1176_vm4 = vmor %vm1174_vm3, %vm1175_vm1 }
 0x206   :  { %v1161_v4 = vmul.f32 0.5, %v1160_v24  ;;  %v1170_v36 = vmul.f32 %v1619_v52, %v1169_v15  ;;  %vm1184_vm7 = vweird.f32 %v3136_v27 }
 0x207   :  { %v1118_v12 = vsub.f32 %v1102_v5, %v1110_v21  ;;  %v1242_v19 = vsub.f32 %v1226_v54, %v1234_v22 }
 0x208   :  { %v1162_v39 = vsub.f32 1.5, %v1161_v4  ;;  %v1171_v26 = vmul.f32 0.5, %v1170_v36 }
 0x209   :  { %v1126_v20 = vadd.f32 0.001, %v1118_v12  ;;  %1356 = vperm.xlu2 %1604, %v1242_v19   ;;  %1260 = vperm.xlu0 %1605, %v1218_v34  }
 0x20a   :  { %v1163_v60 = vmul.f32 %v1617_v48, %v1162_v39  ;;  %v1172_v38 = vsub.f32 1.5, %v1171_v26  ;;  %v959_v24 = vpop.xlane.xlu1 %958 }
 0x20b   :  { %v1621_v15 = vpop.eup %1620  ;;  %1622 = vrsqrt.f32 %v1126_v20  ;;  %v3151_v1 = vmul.f32 0.0012755102, %v959_v24  ;;  %vm1194_vm10 = vweird.f32 %v1126_v20 }
 0x20c   :  { %v1167_v21 = vsel %vm1166_vm2, %v1617_v48, %v1163_v60  ;;  %v1173_v5 = vmul.f32 %v1619_v52, %v1172_v38  ;;  %v1179_v54 = vmul.f32 %v1621_v15, %v3136_v27  ;;  %v1087_v4 = vpop.xlane.xlu0 %1086  ;;  %v1227_v60 = vld [vmem:[%s3289_s4 + $0x18] sm:$0xff]  ;;  %vm1185_vm6 = vweird.f32 %v1621_v15 }
 0x20d   :  { %v1219_v36 = vmul.f32 %v1211_v31, %v1167_v21  ;;  %v1111_v34 = vmul.f32 %v3151_v1, %v3151_v1  ;;  %v1103_v22 = vmul.f32 0.0012755102, %v1087_v4  ;;  %v1228_v31 = vld [vmem:[%s3289_s4 + $0x20] sm:$0xff]  ;;  %vm1186_vm8 = vmor %vm1184_vm7, %vm1185_vm6 }
 0x20e   :  { %v1180_v12 = vmul.f32 %v1621_v15, %v1179_v54  ;;  %v1177_v10 = vsel %vm1176_vm4, %v1619_v52, %v1173_v5 }
 0x20f   :  { %v1235_v48 = vmul.f32 %v1219_v36, %v3111_v14  ;;  %v1119_v39 = vsub.f32 %v1103_v22, %v1111_v34  ;;  %v1220_v26 = vmul.f32 %v1212_v8, %v1177_v10  ;;  %v1213_v14 = vld [vmem:[%s3288_s3 + $0x28] sm:$0xff] }
 0x210   :  { %v1181_v19 = vmul.f32 0.5, %v1180_v12 }
 0x211   :  { %v1623_v38 = vpop.eup %1622  ;;  %v1127_v24 = vadd.f32 0.001, %v1119_v39  ;;  %v1243_v21 = vsub.f32 %v1227_v60, %v1235_v48  ;;  %v1236_v4 = vmul.f32 %v1220_v26, %v3115_v0  ;;  %1265 = vperm.xlu2 %1604, %v1219_v36  }
 0x212   :  { %v1182_v54 = vsub.f32 1.5, %v1181_v19  ;;  %v1189_v46 = vmul.f32 %v1623_v38, %v1126_v20  ;;  %vm1195_vm9 = vweird.f32 %v1623_v38 }
 0x213   :  { %1624 = vrsqrt.f32 %v1127_v24  ;;  %1361 = vperm.xlu1 %1603, %v1243_v21   ;;  %v1244_v52 = vsub.f32 %v1228_v31, %v1236_v4  ;;  %vm1196_vm11 = vmor %vm1194_vm10, %vm1195_vm9  ;;  %vm1204_vm13 = vweird.f32 %v1127_v24  ;;  %v1215_v21 = vld [vmem:[%s3288_s3 + $0x38] sm:$0xff] }
 0x214   :  { %v1183_v5 = vmul.f32 %v1621_v15, %v1182_v54  ;;  %v1190_v8 = vmul.f32 %v1623_v38, %v1189_v46  ;;  %v1214_v46 = vld [vmem:[%s3288_s3 + $0x30] sm:$0xff]  ;;  %v1231_v54 = vld [vmem:[%s3289_s4 + $0x38] sm:$0xff] }
 0x215   :  { %1366 = vperm.xlu0 %1605, %v1244_v52  }
 0x216   :  { %v1187_v34 = vsel %vm1186_vm8, %v1621_v15, %v1183_v5  ;;  %v1191_v22 = vmul.f32 0.5, %v1190_v8  ;;  %v1229_v8 = vld [vmem:[%s3289_s4 + $0x28] sm:$0xff] }
 0x217   :  { %v1221_v0 = vmul.f32 %v1213_v14, %v1187_v34 }
 0x218   :  { %v1192_v12 = vsub.f32 1.5, %v1191_v22 }
 0x219   :  { %v1625_v60 = vpop.eup %1624  ;;  %1275 = vperm.xlu2 %1604, %v1221_v0   ;;  %v1237_v52 = vmul.f32 %v1221_v0, %v3125_v49 }
 0x21a   :  { %v1199_v10 = vmul.f32 %v1625_v60, %v1127_v24  ;;  %v1193_v36 = vmul.f32 %v1623_v38, %v1192_v12  ;;  %vm1205_vm12 = vweird.f32 %v1625_v60 }
 0x21b   :  { %1270 = vperm.xlu1 %1603, %v1220_v26   ;;  %vm1206_vm14 = vmor %vm1204_vm13, %vm1205_vm12 }
 0x21c   :  { %v1200_v48 = vmul.f32 %v1625_v60, %v1199_v10  ;;  %v1197_v19 = vsel %vm1196_vm11, %v1623_v38, %v1193_v36  ;;  %v1230_v38 = vld [vmem:[%s3289_s4 + $0x30] sm:$0xff]  ;;  %v3342_v36 = vld [vmem:[#allocation10_spill] sm:$0xff]  ;;  %s1653_s4 = smov [#allocation2]  }
 0x21d   :  { %v1222_v15 = vmul.f32 %v1214_v46, %v1197_v19  ;;  %v3344_v19 = vld [vmem:[#allocation18_spill] sm:$0xff]  ;;  %s1500_s2 = sshll.u32 %s1653_s4, 4  ;;  %s1501_s2 = int_to_ptr.vmem [resolvable:$true] %s1500_s2 }
 0x21e   :  { %v1201_v39 = vmul.f32 0.5, %v1200_v48  ;;  %v3343_v48 = vld [vmem:[#allocation5_spill] sm:$0xff] }
 0x21f   :  { %v1238_v4 = vmul.f32 %v1222_v15, %v3138_v43  ;;  %v1245_v43 = vsub.f32 %v1229_v8, %v1237_v52 }
 0x220   :  { %v1202_v27 = vsub.f32 1.5, %v1201_v39 }
 0x221   :  { %v1246_v14 = vsub.f32 %v1230_v38, %v1238_v4 }
 0x222   :  { %v1203_v31 = vmul.f32 %v1625_v60, %v1202_v27 }
 0x223   :  { %1280 = vperm.xlu1 %1603, %v1222_v15  }
 0x224   :  { %v1207_v20 = vsel %vm1206_vm14, %v1625_v60, %v1203_v31  ;;  %v3341_v60 = vld [vmem:[#allocation9_spill] sm:$0xff] }
 0x225   :  { %v1223_v26 = vmul.f32 %v1215_v21, %v1207_v20 }
 0x227   :  { %1285 = vperm.xlu2 %1604, %v1223_v26   ;;  %v1239_v24 = vmul.f32 %v1223_v26, %v3151_v1 }
 0x229   :  { %v1247_v5 = vsub.f32 %v1231_v54, %v1239_v24 }
 0x22b   :  { %1376 = vperm.xlu1 %1603, %v1246_v14   ;;  %1381 = vperm.xlu0 %1605, %v1247_v5   ;;  %v3346_v14 = vld [vmem:[#allocation12_spill] sm:$0xff] }
 0x22f   :  { %1371 = vperm.xlu2 %1604, %v1245_v43  }
 0x257   :  { %v1256_v34 = vpop.permute.xlu2 %1255 }
 0x258   :  { %v1296_v5 = vmul.f32 %v1256_v34, %v3346_v14  ;;  %v1299_v43 = vmul.f32 %v1256_v34, %v2865_v50  ;;  %v3348_v50 = vld [vmem:[#allocation13_spill] sm:$0xff] }
 0x261   :  { %v1251_v22 = vpop.permute.xlu1 %1250 }
 0x262   :  { %v1288_v10 = vmul.f32 %v1251_v22, %v3341_v60  ;;  %v1289_v1 = vmul.f32 %v1251_v22, %v3342_v36  ;;  %v1290_v49 = vmul.f32 %v1251_v22, %v3343_v48  ;;  %v1291_v0 = vmul.f32 %v1251_v22, %v2827_v35  ;;  %v3345_v35 = vld [vmem:[#allocation11_spill] sm:$0xff]  ;;  %v3347_v48 = vld [vmem:[#allocation20_spill] sm:$0xff] }
 0x263   :  { %v3191_v12 = vpop.permute.xlu2 %1356  ;;  %v1292_v46 = vmul.f32 %v1251_v22, %v3344_v19  ;;  %v1293_v21 = vmul.f32 %v1251_v22, %v2849_v42  ;;  %v1294_v26 = vmul.f32 %v1251_v22, %v2854_v59  ;;  %v1295_v52 = vmul.f32 %v1256_v34, %v3345_v35 }
 0x264   :  { %v1297_v42 = vmul.f32 %v1256_v34, %v2695_v6  ;;  %v1298_v59 = vmul.f32 %v1256_v34, %v2847_v63  ;;  %v1300_v36 = vmul.f32 %v1256_v34, %v2881_v56  ;;  %v3349_v56 = vld [vmem:[#allocation14_spill] sm:$0xff] }
 0x269   :  { %v1347_v39 = vpop.permute.xlu1 %1346 }
 0x26a   :  { %v1384_v27 = vadd.f32 %v1347_v39, %v1288_v10  ;;  %v1385_v15 = vadd.f32 %v1347_v39, %v1289_v1  ;;  %v1386_v31 = vadd.f32 %v1347_v39, %v1290_v49  ;;  %v1387_v20 = vadd.f32 %v1347_v39, %v1291_v0 }
 0x26b   :  { %v1388_v4 = vadd.f32 %v1347_v39, %v1292_v46  ;;  %v1389_v38 = vadd.f32 %v1347_v39, %v1293_v21  ;;  %v1390_v54 = vadd.f32 %v1347_v39, %v1294_v26  ;;  %v1266_v24 = vpop.permute.xlu2 %1265  ;;  %v1301_v49 = vmul.f32 %v1256_v34, %v3347_v48 }
 0x26c   :  { %1440 = vst [vmem:[#allocation2] sm:$0xff] %v1384_v27 }
 0x26d   :  { %1441 = vst [vmem:[#allocation2 + $0x8] sm:$0xff] %v1385_v15  ;;  %v3350_v15 = vld [vmem:[#allocation6_spill] sm:$0xff] }
 0x26e   :  { %1442 = vst [vmem:[#allocation2 + $0x10] sm:$0xff] %v1386_v31  ;;  %v3351_v31 = vld [vmem:[#allocation19_spill] sm:$0xff] }
 0x26f   :  { %1443 = vst [vmem:[#allocation2 + $0x18] sm:$0xff] %v1387_v20 }
 0x270   :  { %1444 = vst [vmem:[#allocation2 + $0x20] sm:$0xff] %v1388_v4 }
 0x271   :  { %1445 = vst [vmem:[#allocation2 + $0x28] sm:$0xff] %v1389_v38 }
 0x272   :  { %1446 = vst.msk [vmem:[#allocation2 + $0x30] sm:$0xff] %vm892_vm5, %v1390_v54 }
 0x273   :  { %v1352_v8 = vpop.permute.xlu0 %1351  ;;  %v3208_v19 = vpop.permute.xlu2 %1275 }
 0x274   :  { %v1391_v22 = vadd.f32 %v1352_v8, %v1295_v52  ;;  %v1392_v60 = vadd.f32 %v1352_v8, %v1296_v5  ;;  %v1393_v10 = vadd.f32 %v1352_v8, %v1297_v42  ;;  %v1394_v1 = vadd.f32 %v1352_v8, %v1298_v59 }
 0x275   :  { %v1395_v0 = vadd.f32 %v1352_v8, %v1299_v43  ;;  %v1396_v39 = vadd.f32 %v1352_v8, %v1300_v36  ;;  %v1397_v6 = vadd.f32 %v1352_v8, %v1301_v49  ;;  %v1311_v59 = vmul.f32 %v1266_v24, %v2719_v18 }
 0x276   :  { %1447 = vst [vmem:[#allocation2 + $0x38] sm:$0xff] %v1391_v22  ;;  %v1312_v8 = vmul.f32 %v1266_v24, %v2912_v2  ;;  %v1313_v22 = vmul.f32 %v1266_v24, %v2928_v45  ;;  %v1323_v2 = vmul.f32 %v3208_v19, %v2685_v3  ;;  %v1324_v49 = vmul.f32 %v3208_v19, %v2693_v11 }
 0x277   :  { %1448 = vst [vmem:[#allocation2 + $0x40] sm:$0xff] %v1392_v60  ;;  %v1327_v3 = vmul.f32 %v3208_v19, %v3001_v29  ;;  %v1328_v11 = vmul.f32 %v3208_v19, %v3027_v62 }
 0x278   :  { %1449 = vst [vmem:[#allocation2 + $0x48] sm:$0xff] %v1393_v10 }
 0x279   :  { %1450 = vst [vmem:[#allocation2 + $0x50] sm:$0xff] %v1394_v1 }
 0x27a   :  { %1451 = vst [vmem:[#allocation2 + $0x58] sm:$0xff] %v1395_v0 }
 0x27b   :  { %1452 = vst [vmem:[#allocation2 + $0x60] sm:$0xff] %v1396_v39  ;;  %v1261_v63 = vpop.permute.xlu0 %1260 }
 0x27c   :  { %1453 = vst.msk [vmem:[#allocation2 + $0x68] sm:$0xff] %vm892_vm5, %v1397_v6  ;;  %v1302_v46 = vmul.f32 %v1261_v63, %v3348_v50  ;;  %v1303_v27 = vmul.f32 %v1261_v63, %v3349_v56  ;;  %v1304_v34 = vmul.f32 %v1261_v63, %v3350_v15  ;;  %v1305_v21 = vmul.f32 %v1261_v63, %v3351_v31 }
 0x27d   :  { %v1306_v20 = vmul.f32 %v1261_v63, %v2898_v57  ;;  %v1307_v26 = vmul.f32 %v1261_v63, %v2914_v16  ;;  %v1308_v4 = vmul.f32 %v1261_v63, %v2921_v28  ;;  %v1309_v28 = vmul.f32 %v1266_v24, %v2764_v44 }
 0x27e   :  { %v1398_v38 = vadd.f32 %v3191_v12, %v1302_v46  ;;  %v1399_v54 = vadd.f32 %v3191_v12, %v1303_v27  ;;  %v1400_v35 = vadd.f32 %v3191_v12, %v1304_v34  ;;  %v1401_v52 = vadd.f32 %v3191_v12, %v1305_v21 }
 0x27f   :  { %v1402_v14 = vadd.f32 %v3191_v12, %v1306_v20  ;;  %v1403_v42 = vadd.f32 %v3191_v12, %v1307_v26  ;;  %v1404_v57 = vadd.f32 %v3191_v12, %v1308_v4  ;;  %v1310_v16 = vmul.f32 %v1266_v24, %v2773_v40 }
 0x280   :  { %1454 = vst [vmem:[#allocation2 + $0x70] sm:$0xff] %v1398_v38  ;;  %v1314_v12 = vmul.f32 %v1266_v24, %v2954_v47  ;;  %v1315_v40 = vmul.f32 %v1266_v24, %v2962_v37  ;;  %v1325_v47 = vmul.f32 %v3208_v19, %v2747_v30  ;;  %v1326_v37 = vmul.f32 %v3208_v19, %v2982_v32 }
 0x281   :  { %v3223_v5 = vpop.permute.xlu2 %1285  ;;  %1455 = vst [vmem:[#allocation2 + $0x78] sm:$0xff] %v1399_v54  ;;  %v1329_v50 = vmul.f32 %v3208_v19, %v3035_v9 }
 0x282   :  { %1456 = vst [vmem:[#allocation2 + $0x80] sm:$0xff] %v1400_v35 }
 0x283   :  { %1457 = vst [vmem:[#allocation2 + $0x88] sm:$0xff] %v1401_v52 }
 0x284   :  { %1458 = vst [vmem:[#allocation2 + $0x90] sm:$0xff] %v1402_v14 }
 0x285   :  { %v1362_v43 = vpop.permute.xlu1 %1361  ;;  %1459 = vst [vmem:[#allocation2 + $0x98] sm:$0xff] %v1403_v42  ;;  %v3352_v42 = vld [vmem:[#allocation22_spill] sm:$0xff] }
 0x286   :  { %v1405_v60 = vadd.f32 %v1362_v43, %v1309_v28  ;;  %v1406_v10 = vadd.f32 %v1362_v43, %v1310_v16  ;;  %v1407_v36 = vadd.f32 %v1362_v43, %v1311_v59  ;;  %1460 = vst.msk [vmem:[#allocation2 + $0xa0] sm:$0xff] %vm892_vm5, %v1404_v57  ;;  %v1408_v44 = vadd.f32 %v1362_v43, %v1312_v8  ;;  %v3353_v16 = vld [vmem:[#allocation23_spill] sm:$0xff] }
 0x287   :  { %v1409_v1 = vadd.f32 %v1362_v43, %v1313_v22  ;;  %v1410_v18 = vadd.f32 %v1362_v43, %v1314_v12  ;;  %v1411_v45 = vadd.f32 %v1362_v43, %v1315_v40  ;;  %v1367_v27 = vpop.permute.xlu0 %1366  ;;  %v3355_v22 = vld [vmem:[#allocation8_spill] sm:$0xff]  ;;  %v3357_v12 = vld [vmem:[#allocation21_spill] sm:$0xff] }
 0x288   :  { %1461 = vst [vmem:[#allocation2 + $0xa8] sm:$0xff] %v1405_v60  ;;  %v3356_v60 = vld [vmem:[#allocation15_spill] sm:$0xff] }
 0x289   :  { %1462 = vst [vmem:[#allocation2 + $0xb0] sm:$0xff] %v1406_v10  ;;  %v1372_v48 = vpop.permute.xlu2 %1371  ;;  %v1339_v10 = vmul.f32 %v3223_v5, %v3356_v60 }
 0x28a   :  { %1463 = vst [vmem:[#allocation2 + $0xb8] sm:$0xff] %v1407_v36  ;;  %v1419_v0 = vadd.f32 %v1372_v48, %v1323_v2  ;;  %v1420_v24 = vadd.f32 %v1372_v48, %v1324_v49  ;;  %v1421_v39 = vadd.f32 %v1372_v48, %v1325_v47  ;;  %v1422_v63 = vadd.f32 %v1372_v48, %v1326_v37  ;;  %v3360_v47 = vld [vmem:[#allocation24_spill] sm:$0xff] }
 0x28b   :  { %1464 = vst [vmem:[#allocation2 + $0xc0] sm:$0xff] %v1408_v44  ;;  %v1423_v46 = vadd.f32 %v1372_v48, %v1327_v3  ;;  %v1424_v56 = vadd.f32 %v1372_v48, %v1328_v11  ;;  %v1425_v15 = vadd.f32 %v1372_v48, %v1329_v50  ;;  %v1340_v44 = vmul.f32 %v3223_v5, %v3357_v12  ;;  %v3359_v48 = vld [vmem:[#allocation17_spill] sm:$0xff] }
 0x28c   :  { %1465 = vst [vmem:[#allocation2 + $0xc8] sm:$0xff] %v1409_v1  ;;  %v3358_v1 = vld [vmem:[#allocation16_spill] sm:$0xff] }
 0x28d   :  { %1466 = vst [vmem:[#allocation2 + $0xd0] sm:$0xff] %v1410_v18  ;;  %v1271_v6 = vpop.permute.xlu1 %1270  ;;  %v1341_v18 = vmul.f32 %v3223_v5, %v3358_v1 }
 0x28e   :  { %1467 = vst.msk [vmem:[#allocation2 + $0xd8] sm:$0xff] %vm892_vm5, %v1411_v45  ;;  %v1316_v30 = vmul.f32 %v1271_v6, %v2673_v58  ;;  %v1317_v32 = vmul.f32 %v1271_v6, %v2681_v61  ;;  %v1318_v29 = vmul.f32 %v1271_v6, %v2733_v25  ;;  %v1319_v34 = vmul.f32 %v1271_v6, %v2943_v13 }
 0x28f   :  { %1475 = vst [vmem:[#allocation2 + $0x118] sm:$0xff] %v1419_v0  ;;  %v1320_v62 = vmul.f32 %v1271_v6, %v2960_v51  ;;  %v1321_v9 = vmul.f32 %v1271_v6, %v2989_v53  ;;  %v1322_v61 = vmul.f32 %v1271_v6, %v2993_v55  ;;  %v1342_v45 = vmul.f32 %v3223_v5, %v3359_v48 }
 0x290   :  { %1476 = vst [vmem:[#allocation2 + $0x120] sm:$0xff] %v1420_v24  ;;  %v1412_v58 = vadd.f32 %v1367_v27, %v1316_v30  ;;  %v1413_v19 = vadd.f32 %v1367_v27, %v1317_v32  ;;  %v1414_v31 = vadd.f32 %v1367_v27, %v1318_v29  ;;  %v1415_v25 = vadd.f32 %v1367_v27, %v1319_v34 }
 0x291   :  { %1477 = vst [vmem:[#allocation2 + $0x128] sm:$0xff] %v1421_v39  ;;  %v1416_v20 = vadd.f32 %v1367_v27, %v1320_v62  ;;  %v1417_v26 = vadd.f32 %v1367_v27, %v1321_v9  ;;  %v1418_v13 = vadd.f32 %v1367_v27, %v1322_v61  ;;  %v1343_v0 = vmul.f32 %v3223_v5, %v3360_v47 }
 0x292   :  { %1478 = vst [vmem:[#allocation2 + $0x130] sm:$0xff] %v1422_v63 }
 0x293   :  { %1479 = vst [vmem:[#allocation2 + $0x138] sm:$0xff] %v1423_v46 }
 0x294   :  { %1480 = vst [vmem:[#allocation2 + $0x140] sm:$0xff] %v1424_v56 }
 0x295   :  { %1481 = vst.msk [vmem:[#allocation2 + $0x148] sm:$0xff] %vm892_vm5, %v1425_v15  ;;  %v1281_v21 = vpop.permute.xlu1 %1280 }
 0x296   :  { %1468 = vst [vmem:[#allocation2 + $0xe0] sm:$0xff] %v1412_v58  ;;  %v1330_v51 = vmul.f32 %v1281_v21, %v2697_v7  ;;  %v1331_v53 = vmul.f32 %v1281_v21, %v2705_v23  ;;  %v1332_v55 = vmul.f32 %v1281_v21, %v2761_v41  ;;  %v1333_v4 = vmul.f32 %v1281_v21, %v3015_v17  ;;  %v3354_v23 = vld [vmem:[#allocation7_spill] sm:$0xff] }
 0x297   :  { %1469 = vst [vmem:[#allocation2 + $0xe8] sm:$0xff] %v1413_v19  ;;  %v1334_v54 = vmul.f32 %v1281_v21, %v3033_v33  ;;  %v1335_v57 = vmul.f32 %v1281_v21, %v3352_v42  ;;  %v1336_v59 = vmul.f32 %v1281_v21, %v3353_v16  ;;  %v1337_v41 = vmul.f32 %v3223_v5, %v3354_v23 }
 0x298   :  { %1470 = vst [vmem:[#allocation2 + $0xf0] sm:$0xff] %v1414_v31  ;;  %v1338_v33 = vmul.f32 %v3223_v5, %v3355_v22 }
 0x299   :  { %1471 = vst [vmem:[#allocation2 + $0xf8] sm:$0xff] %v1415_v25 }
 0x29a   :  { %1472 = vst [vmem:[#allocation2 + $0x100] sm:$0xff] %v1416_v20 }
 0x29b   :  { %1473 = vst [vmem:[#allocation2 + $0x108] sm:$0xff] %v1417_v26 }
 0x29c   :  { %1474 = vst.msk [vmem:[#allocation2 + $0x110] sm:$0xff] %vm892_vm5, %v1418_v13 }
 0x29d   :  { %v1377_v38 = vpop.permute.xlu1 %1376  ;;  %v1382_v7 = vpop.permute.xlu0 %1381 }
 0x29e   :  { %v1426_v35 = vadd.f32 %v1377_v38, %v1330_v51  ;;  %v1427_v52 = vadd.f32 %v1377_v38, %v1331_v53  ;;  %v1428_v14 = vadd.f32 %v1377_v38, %v1332_v55  ;;  %v1429_v28 = vadd.f32 %v1377_v38, %v1333_v4 }
 0x29f   :  { %v1430_v8 = vadd.f32 %v1377_v38, %v1334_v54  ;;  %v1431_v43 = vadd.f32 %v1377_v38, %v1335_v57  ;;  %v1432_v17 = vadd.f32 %v1377_v38, %v1336_v59  ;;  %v1433_v36 = vadd.f32 %v1382_v7, %v1337_v41 }
 0x2a0   :  { %1482 = vst [vmem:[#allocation2 + $0x150] sm:$0xff] %v1426_v35  ;;  %v1434_v40 = vadd.f32 %v1382_v7, %v1338_v33  ;;  %v1435_v2 = vadd.f32 %v1382_v7, %v1339_v10  ;;  %v1436_v49 = vadd.f32 %v1382_v7, %v1340_v44  ;;  %v1437_v37 = vadd.f32 %v1382_v7, %v1341_v18 }
 0x2a1   :  { %1483 = vst [vmem:[#allocation2 + $0x158] sm:$0xff] %v1427_v52  ;;  %v1438_v24 = vadd.f32 %v1382_v7, %v1342_v45  ;;  %v1439_v3 = vadd.f32 %v1382_v7, %v1343_v0 }
 0x2a2   :  { %1484 = vst [vmem:[#allocation2 + $0x160] sm:$0xff] %v1428_v14 }
 0x2a3   :  { %1485 = vst [vmem:[#allocation2 + $0x168] sm:$0xff] %v1429_v28 }
 0x2a4   :  { %1486 = vst [vmem:[#allocation2 + $0x170] sm:$0xff] %v1430_v8 }
 0x2a5   :  { %1487 = vst [vmem:[#allocation2 + $0x178] sm:$0xff] %v1431_v43 }
 0x2a6   :  { %1488 = vst.msk [vmem:[#allocation2 + $0x180] sm:$0xff] %vm892_vm5, %v1432_v17 }
 0x2a7   :  { %1489 = vst [vmem:[#allocation2 + $0x188] sm:$0xff] %v1433_v36 }
 0x2a8   :  { %1490 = vst [vmem:[#allocation2 + $0x190] sm:$0xff] %v1434_v40 }
 0x2a9   :  { %1491 = vst [vmem:[#allocation2 + $0x198] sm:$0xff] %v1435_v2 }
 0x2aa   :  { %1492 = vst [vmem:[#allocation2 + $0x1a0] sm:$0xff] %v1436_v49 }
 0x2ab   :  { %1493 = vst [vmem:[#allocation2 + $0x1a8] sm:$0xff] %v1437_v37 }
 0x2ac   :  { %1494 = vst [vmem:[#allocation2 + $0x1b0] sm:$0xff] %v1438_v24 }
 0x2ad   :  { %1495 = vst.msk [vmem:[#allocation2 + $0x1b8] sm:$0xff] %vm892_vm5, %v1439_v3 }
 0x2ae   :  { %1508 = dma.vmem_to_hbm [thread:$0]  %s1501_s2, 7168, %s1503_s6, [#allocation3], %s1654_s7, %s1654_s7, %s1655_s0  }
 0x2af   :  { %1650 = dma.done.wait [#allocation3], 7168  }
 0x2b0   :  { %1651 = vsyncadd [#allocation3], 4294960128 }
 0x2b1   :  { %1513 = vsyncpa [#allocation3], 1 }

</bundles_post_ra>
